<compile_context>
chip_gen: v6e
topology: v6e:2x2x1
jax: 0.10.0
libtpu: 0.0.40
codegen_flags: <defaults>
</compile_context>

<pallas_src>
import math

import numpy as np

import jax
import jax.numpy as jnp
from jax.experimental import pallas as pl
from jax.experimental.pallas import tpu as pltpu

# ----------------------------------------------------------------------------
# Small, self-consistent synthetic configuration (mirrors the module __init__).
# ----------------------------------------------------------------------------
N_MELS = 16                  # preprocess_config: n_mel_channels
REF_ENC_FILTERS = (4, 4, 8)  # conv output channels
REF_ENC_KERNEL = 3
REF_ENC_PAD = 1
REF_ENC_STRIDES = (1, 2, 2)  # per-layer strides
GRU_SIZE = 16                # ref_enc_gru_size
E = 32                       # model_config.encoder.n_hidden
TOKEN_NUM = 8                # reference_encoder.token_num
BOTTLENECK = 24              # bottleneck_size_u
LEAKY_SLOPE = 0.3
IN_EPS = 1e-5


# ----------------------------------------------------------------------------
# Host-side constant builders for the conv-as-matmul reformulation.
# ----------------------------------------------------------------------------
def _conv_out(size, stride):
    return (size + 2 * REF_ENC_PAD - REF_ENC_KERNEL) // stride + 1


def _row_select(n, hin, hout, stride, tap, out_order="bh"):
    """S[(out_row),(b,hi)] = 1 iff hi == stride*ho + tap - pad (zero-pad rows)."""
    s = np.zeros((n * hout, n * hin), np.float32)
    for b in range(n):
        for ho in range(hout):
            hi = stride * ho + tap - REF_ENC_PAD
            if 0 <= hi < hin:
                r = b * hout + ho if out_order == "bh" else ho * n + b
                s[r, b * hin + hi] = 1.0
    return s


def _col_weights(w_conv, win, wout, stride):
    """M_tap[(wi,ci),(wo,co)] = w_conv[tap, wi - stride*wo + pad, ci, co] (else 0)."""
    k, _, cin, cout = w_conv.shape
    place = np.zeros((k, win, wout), np.float32)
    for wo in range(wout):
        for j in range(k):
            wi = stride * wo + j - REF_ENC_PAD
            if 0 <= wi < win:
                place[j, wi, wo] = 1.0
    m = np.einsum("jab,ijcd->iacbd", place, np.asarray(w_conv, np.float32))
    return m.reshape(k, win * cin, wout * cout)


def _pack(items, dtype, align):
    """Pack named 2-D constants into one [rows, 128] slab; return (slab, layout)."""
    LANES = 128
    layout, arrs, rows = {}, [], 0
    for name, a in items:
        a = np.asarray(a, np.float32)
        if a.ndim == 1:
            a = a[None, :]
        assert a.shape[1] <= LANES, (name, a.shape)
        layout[name] = (rows, a.shape[0], a.shape[1])
        arrs.append((rows, a))
        rows += ((a.shape[0] + align - 1) // align) * align
    rows = max(rows, align)
    slab = np.zeros((rows, LANES), np.float32)
    for off, a in arrs:
        slab[off:off + a.shape[0], :a.shape[1]] = a
    return jnp.asarray(slab, dtype=dtype), layout


# ----------------------------------------------------------------------------
# The single fused kernel.
# ----------------------------------------------------------------------------
def _make_kernel(n, layer_specs, lay_f32, lay_bf16, gru_h, t3):
    def kernel(x_ref, mask_ref, cf_ref, cb_ref, o_ref):
        f32, bf16 = jnp.float32, jnp.bfloat16

        def cf(name):                                    # f32 constant view
            off, r, c = lay_f32[name]
            return cf_ref[pl.ds(off, r), pl.ds(0, c)]

        def cb(name):                                    # bf16 constant view
            off, r, c = lay_bf16[name]
            return cb_ref[pl.ds(off, r), pl.ds(0, c)]

        # --- ReferenceEncoder conv stack: conv3x3 -> InstanceNorm2d -> leaky_relu
        #     conv == sum_tap  S_tap @ X @ M_tap  (S taps vstacked -> 1 dot).
        y = x_ref[...]                                   # [N*T, n_mels] f32
        for li, sp in enumerate(layer_specs):
            nh, cout = sp["nh"], sp["cout"]
            rows = jnp.dot(cb(f"S{li}"), y.astype(bf16), preferred_element_type=f32)
            acc = jnp.dot(rows[0:nh].astype(bf16), cb(f"M{li}_0"),
                          preferred_element_type=f32)
            acc += jnp.dot(rows[nh:2 * nh].astype(bf16), cb(f"M{li}_1"),
                           preferred_element_type=f32)
            acc += jnp.dot(rows[2 * nh:3 * nh].astype(bf16), cb(f"M{li}_2"),
                           preferred_element_type=f32)
            if li == 0:
                # Constant CoordConv (xx, yy, rr) contribution, folded at build time.
                acc += cf("coord_bias")
            # (Conv2d bias omitted: a per-channel constant shift is exactly
            #  cancelled by the InstanceNorm mean subtraction.)
            # InstanceNorm2d: both moments from one row-stacked pool (2 dots).
            cat = jnp.concatenate([acc, acc * acc], axis=0)            # [2*nh, wc]
            mom = jnp.dot(jnp.dot(cf(f"B2{li}"), cat, preferred_element_type=f32),
                          cf(f"P{li}"), preferred_element_type=f32)    # [2n, c]
            inv_sp = 1.0 / float(sp["hout"] * sp["wout"])
            mean, msq = mom[0:n] * inv_sp, mom[n:2 * n] * inv_sp
            var = msq - mean * mean
            gb = cf(f"gb{li}")                                         # [2, c]
            scale = gb[0:1] * jax.lax.rsqrt(var + IN_EPS)              # gamma * rstd
            shift = gb[1:2] - mean * scale                             # beta - mean*scale
            full = jnp.dot(jnp.dot(cf(f"Bt2{li}"),
                                   jnp.concatenate([scale, shift], axis=0),
                                   preferred_element_type=f32),
                           cf(f"Pt{li}"), preferred_element_type=f32)  # [2*nh, wc]
            acc = acc * full[0:nh] + full[nh:2 * nh]
            y = jnp.where(acc >= 0.0, acc, LEAKY_SLOPE * acc)

        # --- GRU (pack_padded_sequence parity: gated per-step hidden update).
        #     Last conv layer emits rows in (t, b) order; the input projection
        #     (with the (w,c)->(c,w) flatten folded into w_ih) is one dot.
        gi_all = (jnp.dot(y.astype(bf16), cb("w_ih"), preferred_element_type=f32)
                  + cf("b_ih"))                                        # [t3*n, 3H]
        w_hh, b_hh = cf("w_hh"), cf("b_hh")
        h = jnp.zeros((n, gru_h), f32)
        for ti in range(t3):
            gi = gi_all[ti * n:(ti + 1) * n]                           # [n, 3H]
            gh = jnp.dot(h, w_hh, preferred_element_type=f32) + b_hh
            r = jax.nn.sigmoid(gi[:, 0:gru_h] + gh[:, 0:gru_h])
            z = jax.nn.sigmoid(gi[:, gru_h:2 * gru_h] + gh[:, gru_h:2 * gru_h])
            cg = jnp.tanh(gi[:, 2 * gru_h:3 * gru_h] + r * gh[:, 2 * gru_h:3 * gru_h])
            h_new = (1.0 - z) * cg + z * h
            m_t = mask_ref[pl.ds(ti * n, n), pl.ds(0, 1)]              # [n, 1]
            h = m_t * h_new + (1.0 - m_t) * h                          # freeze on padding

        # --- (encoder_prj ∘ STL query) -> token attention -> encoder_bottleneck.
        q = jnp.dot(h, cf("wq_c"), preferred_element_type=f32) + cf("bq")   # scale folded
        s = jnp.dot(q, cf("k_t"), preferred_element_type=f32)
        s = s - jnp.max(s, axis=-1, keepdims=True)
        p = jnp.exp(s)
        p = p / jnp.sum(p, axis=-1, keepdims=True)                     # exact (parity)
        attn = jnp.dot(p, cf("v"), preferred_element_type=f32)         # [N, E]
        o_ref[...] = (jnp.dot(attn, cf("bot_w"), preferred_element_type=f32)
                      + cf("bot_b"))

    return kernel


# ----------------------------------------------------------------------------
# Plan: every batch-independent constant packed into two lane-dense slabs.
# ----------------------------------------------------------------------------
def build_plan(params, n, t):
    bf_items, f32_items, layer_specs = [], [], []
    h, w = t, N_MELS
    n_layers = len(REF_ENC_FILTERS)
    for li, (cout, s) in enumerate(zip(REF_ENC_FILTERS, REF_ENC_STRIDES)):
        w_conv = np.asarray(params["convs"][li][0], np.float32)   # [kh, kw, cin, cout]
        hout, wout = _conv_out(h, s), _conv_out(w, s)
        out_order = "hb" if li == n_layers - 1 else "bh"          # last layer: rows (t, b)
        S = np.concatenate([_row_select(n, h, hout, s, tap, out_order)
                            for tap in range(REF_ENC_KERNEL)], axis=0)
        bf_items.append((f"S{li}", S))
        w_in = w_conv[:, :, 0:1, :] if li == 0 else w_conv        # mel channel only at runtime
        M = _col_weights(w_in, w, wout, s)
        for tap in range(REF_ENC_KERNEL):
            bf_items.append((f"M{li}_{tap}", M[tap]))
        if li == 0:
            # CoordConv(with_r) coordinate channels -> constant layer-1 bias map.
            xs = (np.arange(N_MELS, dtype=np.float32) / (N_MELS - 1)) * 2.0 - 1.0
            ys = (np.arange(t, dtype=np.float32) / (t - 1)) * 2.0 - 1.0
            xx = np.tile(xs[None, :], (t, 1))
            yy = np.tile(ys[:, None], (1, N_MELS))
            rr = np.sqrt((xx - 0.5) ** 2 + (yy - 0.5) ** 2)
            coords2d = np.stack([xx, yy, rr], axis=-1).reshape(t, N_MELS * 3)
            Mc = _col_weights(w_conv[:, :, 1:4, :], w, wout, s)
            bias_one = sum(_row_select(1, h, hout, s, tap, "bh") @ coords2d @ Mc[tap]
                           for tap in range(REF_ENC_KERNEL))
            f32_items.append(("coord_bias", np.tile(bias_one, (n, 1))))
        nh, wc = n * hout, wout * cout
        B2 = np.zeros((2 * n, 2 * nh), np.float32)                # row-pool (sums | sq-sums)
        Bt2 = np.zeros((2 * nh, 2 * n), np.float32)               # row-broadcast (scale | shift)
        for b in range(n):
            for ho in range(hout):
                r = b * hout + ho if out_order == "bh" else ho * n + b
                B2[b, r] = B2[n + b, nh + r] = 1.0
                Bt2[r, b] = Bt2[nh + r, n + b] = 1.0
        P = np.zeros((wc, cout), np.float32)                      # (w,c) lanes -> channel pool
        for wi in range(wout):
            for ci in range(cout):
                P[wi * cout + ci, ci] = 1.0
        gb = np.stack([np.asarray(params["convs"][li][2], np.float32).reshape(-1),
                       np.asarray(params["convs"][li][3], np.float32).reshape(-1)], axis=0)
        f32_items += [(f"B2{li}", B2), (f"Bt2{li}", Bt2),
                      (f"P{li}", P), (f"Pt{li}", P.T), (f"gb{li}", gb)]
        layer_specs.append(dict(hout=hout, wout=wout, cout=cout, nh=nh, wc=wc))
        h, w = hout, wout

    t3, w3, c3 = layer_specs[-1]["hout"], layer_specs[-1]["wout"], layer_specs[-1]["cout"]
    # Fold the PyTorch (C, W) channel-major flatten into the GRU input weights.
    qp = np.zeros((w3 * c3, c3 * w3), np.float32)
    for wi in range(w3):
        for ci in range(c3):
            qp[wi * c3 + ci, ci * w3 + wi] = 1.0
    bf_items.append(("w_ih", qp @ np.asarray(params["gru_w_ih"], np.float32)))
    f32_items += [("w_hh", np.asarray(params["gru_w_hh"], np.float32)),
                  ("b_ih", np.asarray(params["gru_b_ih"], np.float32)),
                  ("b_hh", np.asarray(params["gru_b_hh"], np.float32))]

    # encoder_prj folded into the STL query projection (incl. 1/sqrt(E) scale);
    # style-token keys/values hoisted (batch-independent constants).
    inv_sqrt_e = 1.0 / math.sqrt(E)
    prj_w = np.asarray(params["prj_w"], np.float32)
    prj_b = np.asarray(params["prj_b"], np.float32)
    wq = np.asarray(params["wq"], np.float32)
    keys_soft = np.tanh(np.asarray(params["stl_embed"], np.float32))
    f32_items += [("wq_c", (prj_w @ wq) * inv_sqrt_e),
                  ("bq", (prj_b @ wq) * inv_sqrt_e),
                  ("k_t", (keys_soft @ np.asarray(params["wk"], np.float32)).T),
                  ("v", keys_soft @ np.asarray(params["wv"], np.float32)),
                  ("bot_w", np.asarray(params["bottleneck_w"], np.float32)),
                  ("bot_b", np.asarray(params["bottleneck_b"], np.float32))]

    cbf16, lay_bf16 = _pack(bf_items, jnp.bfloat16, align=16)
    cf32, lay_f32 = _pack(f32_items, jnp.float32, align=8)
    return dict(n=n, t=t, t3=t3, layer_specs=layer_specs,
                cbf16=cbf16, lay_bf16=lay_bf16, cf32=cf32, lay_f32=lay_f32)


# ----------------------------------------------------------------------------
# Forward: minimal wrapper-side assembly + one pallas_call (4 operands total).
# ----------------------------------------------------------------------------
def utterance_level_prosody_encoder(plan, mels, mel_lens):
    n, t, t3 = plan["n"], plan["t"], plan["t3"]
    assert mels.shape == (n, t, N_MELS)

    # Zero padded frames (zero-padded batch semantics), drop to 2-D, rows = (b, t).
    frame_pad = jnp.arange(t)[None, :] >= mel_lens[:, None]
    x = jnp.where(frame_pad[:, :, None], 0.0, mels).reshape(n * t, N_MELS)

    # Per-step GRU validity mask at the strided time resolution, rows = (t, b).
    lens = mel_lens
    for s in REF_ENC_STRIDES:
        lens = (lens + 2 * REF_ENC_PAD - REF_ENC_KERNEL) // s + 1
    mask_g = (jnp.arange(t3)[:, None] < lens[None, :]).astype(jnp.float32)
    mask_g = mask_g.reshape(t3 * n, 1)

    args = (x, mask_g, plan["cf32"], plan["cbf16"])
    # N=2: single program / single TensorCore.  At large batch, add a batch
    # grid axis marked "parallel" (2 TCs on v7x).
    out = pl.pallas_call(
        _make_kernel(n, plan["layer_specs"], plan["lay_f32"], plan["lay_bf16"],
                     GRU_SIZE, t3),
        out_shape=jax.ShapeDtypeStruct((n, BOTTLENECK), jnp.float32),
        grid_spec=pltpu.PrefetchScalarGridSpec(
            num_scalar_prefetch=0,
            grid=(1,),
            in_specs=[pl.BlockSpec(a.shape, lambda i: (0, 0)) for a in args],
            out_specs=pl.BlockSpec((n, BOTTLENECK), lambda i: (0, 0)),
        ),
        compiler_params=pltpu.CompilerParams(dimension_semantics=("arbitrary",)),
    )(*args)

    # nn.Dropout is identity in eval; out.view((-1, 1, out.shape[3])) -> [N, 1, B].
    return out.reshape(n, 1, BOTTLENECK)


# ----------------------------------------------------------------------------
# Deterministic synthetic parameters (shapes match the module __init__).
# ----------------------------------------------------------------------------
def init_params(key):
    keys = jax.random.split(key, 24)
    ki = 0
    params = {}
    cins = (4,) + REF_ENC_FILTERS[:-1]        # CoordConv(with_r): 1 mel + 3 coord channels
    convs = []
    for cin, cout in zip(cins, REF_ENC_FILTERS):
        # Conv weight stored as [kh, kw, cin, cout] (== PyTorch weight.permute(2,3,1,0)).
        w = 0.1 * jax.random.normal(
            keys[ki], (REF_ENC_KERNEL, REF_ENC_KERNEL, cin, cout), jnp.float32); ki += 1
        b = 0.01 * jax.random.normal(keys[ki], (cout,), jnp.float32); ki += 1  # no-op under IN
        convs.append((w, b, jnp.ones((1, cout), jnp.float32),
                      jnp.zeros((1, cout), jnp.float32)))
    params["convs"] = convs

    w_after = N_MELS
    for s in REF_ENC_STRIDES:
        w_after = _conv_out(w_after, s)
    i_size = REF_ENC_FILTERS[-1] * w_after
    # GRU weights with the three gates (r, z, n) fused along the output dim.
    params["gru_w_ih"] = 0.1 * jax.random.normal(keys[ki], (i_size, 3 * GRU_SIZE), jnp.float32); ki += 1
    params["gru_w_hh"] = 0.1 * jax.random.normal(keys[ki], (GRU_SIZE, 3 * GRU_SIZE), jnp.float32); ki += 1
    params["gru_b_ih"] = 0.01 * jax.random.normal(keys[ki], (1, 3 * GRU_SIZE), jnp.float32); ki += 1
    params["gru_b_hh"] = 0.01 * jax.random.normal(keys[ki], (1, 3 * GRU_SIZE), jnp.float32); ki += 1
    params["prj_w"] = 0.1 * jax.random.normal(keys[ki], (GRU_SIZE, E // 2), jnp.float32); ki += 1
    params["prj_b"] = 0.01 * jax.random.normal(keys[ki], (1, E // 2), jnp.float32); ki += 1
    params["stl_embed"] = 0.5 * jax.random.normal(keys[ki], (TOKEN_NUM, E), jnp.float32); ki += 1
    params["wq"] = 0.1 * jax.random.normal(keys[ki], (E // 2, E), jnp.float32); ki += 1
    params["wk"] = 0.1 * jax.random.normal(keys[ki], (E, E), jnp.float32); ki += 1
    params["wv"] = 0.1 * jax.random.normal(keys[ki], (E, E), jnp.float32); ki += 1
    params["bottleneck_w"] = 0.1 * jax.random.normal(keys[ki], (E, BOTTLENECK), jnp.float32); ki += 1
    params["bottleneck_b"] = 0.01 * jax.random.normal(keys[ki], (1, BOTTLENECK), jnp.float32); ki += 1
    return params


if __name__ == "__main__":
    key = jax.random.PRNGKey(0)
    kp, km = jax.random.split(key)
    params = init_params(kp)

    N, T = 2, 16
    mels = jax.random.normal(km, (N, T, N_MELS), jnp.float32)   # [N, Ty/r, n_mels*r]
    mel_lens = jnp.array([16, 12], dtype=jnp.int32)

    plan = build_plan(params, n=N, t=T)        # constants hoisted / packed once per shape
    out = utterance_level_prosody_encoder(plan, mels, mel_lens)
    out = jax.block_until_ready(out)
    assert out.shape == (N, 1, BOTTLENECK), out.shape
    assert bool(jnp.all(jnp.isfinite(out)))
    print("KERNEL_OK")
</pallas_src>

<mosaic_0001>
module attributes {stable_mosaic.version = 11 : i64} {
  func.func @kernel(%arg0: i32, %arg1: memref<32x16xf32, #tpu.memory_space<vmem>>, %arg2: memref<8x1xf32, #tpu.memory_space<vmem>>, %arg3: memref<480x128xf32, #tpu.memory_space<vmem>>, %arg4: memref<544x128xbf16, #tpu.memory_space<vmem>>, %arg5: memref<2x24xf32, #tpu.memory_space<vmem>>) attributes {dimension_semantics = [#tpu.dimension_semantics<arbitrary>], iteration_bounds = array<i64: 1>, scalar_prefetch = 0 : i64, scratch_operands = 0 : i64, tpu.core_type = #tpu.core_type<tc>, window_params = [{pipeline_mode = #tpu.pipeline_mode<synchronous>, transform_indices = @transform_0, window_bounds = array<i64: 32, 16>}, {pipeline_mode = #tpu.pipeline_mode<synchronous>, transform_indices = @transform_1, window_bounds = array<i64: 8, 1>}, {pipeline_mode = #tpu.pipeline_mode<synchronous>, transform_indices = @transform_2, window_bounds = array<i64: 480, 128>}, {pipeline_mode = #tpu.pipeline_mode<synchronous>, transform_indices = @transform_3, window_bounds = array<i64: 544, 128>}, {pipeline_mode = #tpu.pipeline_mode<synchronous>, transform_indices = @transform_4, window_bounds = array<i64: 2, 24>}]} {
    %c0 = arith.constant 0 : index
    %c0_0 = arith.constant 0 : index
    %0 = vector.load %arg1[%c0, %c0_0] : memref<32x16xf32, #tpu.memory_space<vmem>>, vector<32x16xf32>
    %c0_1 = arith.constant 0 : index
    %c0_2 = arith.constant 0 : index
    %1 = vector.load %arg4[%c0_1, %c0_2] : memref<544x128xbf16, #tpu.memory_space<vmem>>, vector<96x32xbf16>
    %2 = arith.truncf %0 : vector<32x16xf32> to vector<32x16xbf16>
    %cst = arith.constant dense<0.000000e+00> : vector<96x16xf32>
    %3 = tpu.matmul %1, %2, %cst {dimension_numbers = #tpu.dot_dimension_numbers<[1], [0], [0], [1], [0, 0, 1, 1], [], []>} : vector<96x32xbf16>, vector<32x16xbf16>, vector<96x16xf32> -> vector<96x16xf32>
    %4 = vector.extract_strided_slice %3 {offsets = [0, 0], sizes = [32, 16], strides = [1, 1]} : vector<96x16xf32> to vector<32x16xf32>
    %5 = arith.truncf %4 : vector<32x16xf32> to vector<32x16xbf16>
    %c96 = arith.constant 96 : index
    %c0_3 = arith.constant 0 : index
    %6 = vector.load %arg4[%c96, %c0_3] : memref<544x128xbf16, #tpu.memory_space<vmem>>, vector<16x64xbf16>
    %cst_4 = arith.constant dense<0.000000e+00> : vector<32x64xf32>
    %7 = tpu.matmul %5, %6, %cst_4 {dimension_numbers = #tpu.dot_dimension_numbers<[1], [0], [0], [1], [0, 0, 1, 1], [], []>} : vector<32x16xbf16>, vector<16x64xbf16>, vector<32x64xf32> -> vector<32x64xf32>
    %8 = vector.extract_strided_slice %3 {offsets = [32, 0], sizes = [32, 16], strides = [1, 1]} : vector<96x16xf32> to vector<32x16xf32>
    %9 = arith.truncf %8 : vector<32x16xf32> to vector<32x16xbf16>
    %c112 = arith.constant 112 : index
    %c0_5 = arith.constant 0 : index
    %10 = vector.load %arg4[%c112, %c0_5] : memref<544x128xbf16, #tpu.memory_space<vmem>>, vector<16x64xbf16>
    %cst_6 = arith.constant dense<0.000000e+00> : vector<32x64xf32>
    %11 = tpu.matmul %9, %10, %cst_6 {dimension_numbers = #tpu.dot_dimension_numbers<[1], [0], [0], [1], [0, 0, 1, 1], [], []>} : vector<32x16xbf16>, vector<16x64xbf16>, vector<32x64xf32> -> vector<32x64xf32>
    %12 = arith.addf %7, %11 : vector<32x64xf32>
    %13 = vector.extract_strided_slice %3 {offsets = [64, 0], sizes = [32, 16], strides = [1, 1]} : vector<96x16xf32> to vector<32x16xf32>
    %14 = arith.truncf %13 : vector<32x16xf32> to vector<32x16xbf16>
    %c128 = arith.constant 128 : index
    %c0_7 = arith.constant 0 : index
    %15 = vector.load %arg4[%c128, %c0_7] : memref<544x128xbf16, #tpu.memory_space<vmem>>, vector<16x64xbf16>
    %cst_8 = arith.constant dense<0.000000e+00> : vector<32x64xf32>
    %16 = tpu.matmul %14, %15, %cst_8 {dimension_numbers = #tpu.dot_dimension_numbers<[1], [0], [0], [1], [0, 0, 1, 1], [], []>} : vector<32x16xbf16>, vector<16x64xbf16>, vector<32x64xf32> -> vector<32x64xf32>
    %17 = arith.addf %12, %16 : vector<32x64xf32>
    %c0_9 = arith.constant 0 : index
    %c0_10 = arith.constant 0 : index
    %18 = vector.load %arg3[%c0_9, %c0_10] : memref<480x128xf32, #tpu.memory_space<vmem>>, vector<32x64xf32>
    %19 = arith.addf %17, %18 : vector<32x64xf32>
    %20 = arith.mulf %19, %19 : vector<32x64xf32>
    %21 = tpu.concatenate %19, %20 in 0 : vector<32x64xf32>, vector<32x64xf32> -> vector<64x64xf32>
    %c32 = arith.constant 32 : index
    %c0_11 = arith.constant 0 : index
    %22 = vector.load %arg3[%c32, %c0_11] : memref<480x128xf32, #tpu.memory_space<vmem>>, vector<4x64xf32>
    %cst_12 = arith.constant dense<0.000000e+00> : vector<4x64xf32>
    %23 = tpu.matmul %22, %21, %cst_12 {dimension_numbers = #tpu.dot_dimension_numbers<[1], [0], [0], [1], [0, 0, 1, 1], [], []>} : vector<4x64xf32>, vector<64x64xf32>, vector<4x64xf32> -> vector<4x64xf32>
    %c104 = arith.constant 104 : index
    %c0_13 = arith.constant 0 : index
    %24 = vector.load %arg3[%c104, %c0_13] : memref<480x128xf32, #tpu.memory_space<vmem>>, vector<64x4xf32>
    %cst_14 = arith.constant dense<0.000000e+00> : vector<4x4xf32>
    %25 = tpu.matmul %23, %24, %cst_14 {dimension_numbers = #tpu.dot_dimension_numbers<[1], [0], [0], [1], [0, 0, 1, 1], [], []>} : vector<4x64xf32>, vector<64x4xf32>, vector<4x4xf32> -> vector<4x4xf32>
    %26 = vector.extract_strided_slice %25 {offsets = [0, 0], sizes = [2, 4], strides = [1, 1]} : vector<4x4xf32> to vector<2x4xf32>
    %cst_15 = arith.constant 3.906250e-03 : f32
    %27 = vector.broadcast %cst_15 : f32 to vector<2x4xf32>
    %28 = arith.mulf %26, %27 : vector<2x4xf32>
    %29 = vector.extract_strided_slice %25 {offsets = [2, 0], sizes = [2, 4], strides = [1, 1]} : vector<4x4xf32> to vector<2x4xf32>
    %cst_16 = arith.constant 3.906250e-03 : f32
    %30 = vector.broadcast %cst_16 : f32 to vector<2x4xf32>
    %31 = arith.mulf %29, %30 : vector<2x4xf32>
    %32 = arith.mulf %28, %28 : vector<2x4xf32>
    %33 = arith.subf %31, %32 : vector<2x4xf32>
    %c176 = arith.constant 176 : index
    %c0_17 = arith.constant 0 : index
    %34 = vector.load %arg3[%c176, %c0_17] : memref<480x128xf32, #tpu.memory_space<vmem>>, vector<2x4xf32>
    %35 = vector.extract_strided_slice %34 {offsets = [0, 0], sizes = [1, 4], strides = [1, 1]} : vector<2x4xf32> to vector<1x4xf32>
    %cst_18 = arith.constant 9.99999974E-6 : f32
    %36 = vector.broadcast %cst_18 : f32 to vector<2x4xf32>
    %37 = arith.addf %33, %36 : vector<2x4xf32>
    %38 = math.rsqrt %37 : vector<2x4xf32>
    %39 = vector.broadcast %35 : vector<1x4xf32> to vector<2x4xf32>
    %40 = arith.mulf %39, %38 : vector<2x4xf32>
    %41 = vector.extract_strided_slice %34 {offsets = [1, 0], sizes = [1, 4], strides = [1, 1]} : vector<2x4xf32> to vector<1x4xf32>
    %42 = arith.mulf %28, %40 : vector<2x4xf32>
    %43 = vector.broadcast %41 : vector<1x4xf32> to vector<2x4xf32>
    %44 = arith.subf %43, %42 : vector<2x4xf32>
    %c40 = arith.constant 40 : index
    %c0_19 = arith.constant 0 : index
    %45 = vector.load %arg3[%c40, %c0_19] : memref<480x128xf32, #tpu.memory_space<vmem>>, vector<64x4xf32>
    %46 = tpu.concatenate %40, %44 in 0 : vector<2x4xf32>, vector<2x4xf32> -> vector<4x4xf32>
    %cst_20 = arith.constant dense<0.000000e+00> : vector<64x4xf32>
    %47 = tpu.matmul %45, %46, %cst_20 {dimension_numbers = #tpu.dot_dimension_numbers<[1], [0], [0], [1], [0, 0, 1, 1], [], []>} : vector<64x4xf32>, vector<4x4xf32>, vector<64x4xf32> -> vector<64x4xf32>
    %c168 = arith.constant 168 : index
    %c0_21 = arith.constant 0 : index
    %48 = vector.load %arg3[%c168, %c0_21] : memref<480x128xf32, #tpu.memory_space<vmem>>, vector<4x64xf32>
    %cst_22 = arith.constant dense<0.000000e+00> : vector<64x64xf32>
    %49 = tpu.matmul %47, %48, %cst_22 {dimension_numbers = #tpu.dot_dimension_numbers<[1], [0], [0], [1], [0, 0, 1, 1], [], []>} : vector<64x4xf32>, vector<4x64xf32>, vector<64x64xf32> -> vector<64x64xf32>
    %50 = vector.extract_strided_slice %49 {offsets = [0, 0], sizes = [32, 64], strides = [1, 1]} : vector<64x64xf32> to vector<32x64xf32>
    %51 = arith.mulf %19, %50 : vector<32x64xf32>
    %52 = vector.extract_strided_slice %49 {offsets = [32, 0], sizes = [32, 64], strides = [1, 1]} : vector<64x64xf32> to vector<32x64xf32>
    %53 = arith.addf %51, %52 : vector<32x64xf32>
    %cst_23 = arith.constant 0.000000e+00 : f32
    %54 = vector.broadcast %cst_23 : f32 to vector<32x64xf32>
    %55 = arith.cmpf oge, %53, %54 : vector<32x64xf32>
    %cst_24 = arith.constant 3.000000e-01 : f32
    %56 = vector.broadcast %cst_24 : f32 to vector<32x64xf32>
    %57 = arith.mulf %56, %53 : vector<32x64xf32>
    %58 = arith.select %55, %53, %57 : vector<32x64xi1>, vector<32x64xf32>
    %c144 = arith.constant 144 : index
    %c0_25 = arith.constant 0 : index
    %59 = vector.load %arg4[%c144, %c0_25] : memref<544x128xbf16, #tpu.memory_space<vmem>>, vector<48x32xbf16>
    %60 = arith.truncf %58 : vector<32x64xf32> to vector<32x64xbf16>
    %cst_26 = arith.constant dense<0.000000e+00> : vector<48x64xf32>
    %61 = tpu.matmul %59, %60, %cst_26 {dimension_numbers = #tpu.dot_dimension_numbers<[1], [0], [0], [1], [0, 0, 1, 1], [], []>} : vector<48x32xbf16>, vector<32x64xbf16>, vector<48x64xf32> -> vector<48x64xf32>
    %62 = vector.extract_strided_slice %61 {offsets = [0, 0], sizes = [16, 64], strides = [1, 1]} : vector<48x64xf32> to vector<16x64xf32>
    %63 = arith.truncf %62 : vector<16x64xf32> to vector<16x64xbf16>
    %c192 = arith.constant 192 : index
    %c0_27 = arith.constant 0 : index
    %64 = vector.load %arg4[%c192, %c0_27] : memref<544x128xbf16, #tpu.memory_space<vmem>>, vector<64x32xbf16>
    %cst_28 = arith.constant dense<0.000000e+00> : vector<16x32xf32>
    %65 = tpu.matmul %63, %64, %cst_28 {dimension_numbers = #tpu.dot_dimension_numbers<[1], [0], [0], [1], [0, 0, 1, 1], [], []>} : vector<16x64xbf16>, vector<64x32xbf16>, vector<16x32xf32> -> vector<16x32xf32>
    %66 = vector.extract_strided_slice %61 {offsets = [16, 0], sizes = [16, 64], strides = [1, 1]} : vector<48x64xf32> to vector<16x64xf32>
    %67 = arith.truncf %66 : vector<16x64xf32> to vector<16x64xbf16>
    %c256 = arith.constant 256 : index
    %c0_29 = arith.constant 0 : index
    %68 = vector.load %arg4[%c256, %c0_29] : memref<544x128xbf16, #tpu.memory_space<vmem>>, vector<64x32xbf16>
    %cst_30 = arith.constant dense<0.000000e+00> : vector<16x32xf32>
    %69 = tpu.matmul %67, %68, %cst_30 {dimension_numbers = #tpu.dot_dimension_numbers<[1], [0], [0], [1], [0, 0, 1, 1], [], []>} : vector<16x64xbf16>, vector<64x32xbf16>, vector<16x32xf32> -> vector<16x32xf32>
    %70 = arith.addf %65, %69 : vector<16x32xf32>
    %71 = vector.extract_strided_slice %61 {offsets = [32, 0], sizes = [16, 64], strides = [1, 1]} : vector<48x64xf32> to vector<16x64xf32>
    %72 = arith.truncf %71 : vector<16x64xf32> to vector<16x64xbf16>
    %c320 = arith.constant 320 : index
    %c0_31 = arith.constant 0 : index
    %73 = vector.load %arg4[%c320, %c0_31] : memref<544x128xbf16, #tpu.memory_space<vmem>>, vector<64x32xbf16>
    %cst_32 = arith.constant dense<0.000000e+00> : vector<16x32xf32>
    %74 = tpu.matmul %72, %73, %cst_32 {dimension_numbers = #tpu.dot_dimension_numbers<[1], [0], [0], [1], [0, 0, 1, 1], [], []>} : vector<16x64xbf16>, vector<64x32xbf16>, vector<16x32xf32> -> vector<16x32xf32>
    %75 = arith.addf %70, %74 : vector<16x32xf32>
    %76 = arith.mulf %75, %75 : vector<16x32xf32>
    %77 = tpu.concatenate %75, %76 in 0 : vector<16x32xf32>, vector<16x32xf32> -> vector<32x32xf32>
    %c184 = arith.constant 184 : index
    %c0_33 = arith.constant 0 : index
    %78 = vector.load %arg3[%c184, %c0_33] : memref<480x128xf32, #tpu.memory_space<vmem>>, vector<4x32xf32>
    %cst_34 = arith.constant dense<0.000000e+00> : vector<4x32xf32>
    %79 = tpu.matmul %78, %77, %cst_34 {dimension_numbers = #tpu.dot_dimension_numbers<[1], [0], [0], [1], [0, 0, 1, 1], [], []>} : vector<4x32xf32>, vector<32x32xf32>, vector<4x32xf32> -> vector<4x32xf32>
    %c224 = arith.constant 224 : index
    %c0_35 = arith.constant 0 : index
    %80 = vector.load %arg3[%c224, %c0_35] : memref<480x128xf32, #tpu.memory_space<vmem>>, vector<32x4xf32>
    %cst_36 = arith.constant dense<0.000000e+00> : vector<4x4xf32>
    %81 = tpu.matmul %79, %80, %cst_36 {dimension_numbers = #tpu.dot_dimension_numbers<[1], [0], [0], [1], [0, 0, 1, 1], [], []>} : vector<4x32xf32>, vector<32x4xf32>, vector<4x4xf32> -> vector<4x4xf32>
    %82 = vector.extract_strided_slice %81 {offsets = [0, 0], sizes = [2, 4], strides = [1, 1]} : vector<4x4xf32> to vector<2x4xf32>
    %cst_37 = arith.constant 1.562500e-02 : f32
    %83 = vector.broadcast %cst_37 : f32 to vector<2x4xf32>
    %84 = arith.mulf %82, %83 : vector<2x4xf32>
    %85 = vector.extract_strided_slice %81 {offsets = [2, 0], sizes = [2, 4], strides = [1, 1]} : vector<4x4xf32> to vector<2x4xf32>
    %cst_38 = arith.constant 1.562500e-02 : f32
    %86 = vector.broadcast %cst_38 : f32 to vector<2x4xf32>
    %87 = arith.mulf %85, %86 : vector<2x4xf32>
    %88 = arith.mulf %84, %84 : vector<2x4xf32>
    %89 = arith.subf %87, %88 : vector<2x4xf32>
    %c264 = arith.constant 264 : index
    %c0_39 = arith.constant 0 : index
    %90 = vector.load %arg3[%c264, %c0_39] : memref<480x128xf32, #tpu.memory_space<vmem>>, vector<2x4xf32>
    %91 = vector.extract_strided_slice %90 {offsets = [0, 0], sizes = [1, 4], strides = [1, 1]} : vector<2x4xf32> to vector<1x4xf32>
    %cst_40 = arith.constant 9.99999974E-6 : f32
    %92 = vector.broadcast %cst_40 : f32 to vector<2x4xf32>
    %93 = arith.addf %89, %92 : vector<2x4xf32>
    %94 = math.rsqrt %93 : vector<2x4xf32>
    %95 = vector.broadcast %91 : vector<1x4xf32> to vector<2x4xf32>
    %96 = arith.mulf %95, %94 : vector<2x4xf32>
    %97 = vector.extract_strided_slice %90 {offsets = [1, 0], sizes = [1, 4], strides = [1, 1]} : vector<2x4xf32> to vector<1x4xf32>
    %98 = arith.mulf %84, %96 : vector<2x4xf32>
    %99 = vector.broadcast %97 : vector<1x4xf32> to vector<2x4xf32>
    %100 = arith.subf %99, %98 : vector<2x4xf32>
    %c192_41 = arith.constant 192 : index
    %c0_42 = arith.constant 0 : index
    %101 = vector.load %arg3[%c192_41, %c0_42] : memref<480x128xf32, #tpu.memory_space<vmem>>, vector<32x4xf32>
    %102 = tpu.concatenate %96, %100 in 0 : vector<2x4xf32>, vector<2x4xf32> -> vector<4x4xf32>
    %cst_43 = arith.constant dense<0.000000e+00> : vector<32x4xf32>
    %103 = tpu.matmul %101, %102, %cst_43 {dimension_numbers = #tpu.dot_dimension_numbers<[1], [0], [0], [1], [0, 0, 1, 1], [], []>} : vector<32x4xf32>, vector<4x4xf32>, vector<32x4xf32> -> vector<32x4xf32>
    %c256_44 = arith.constant 256 : index
    %c0_45 = arith.constant 0 : index
    %104 = vector.load %arg3[%c256_44, %c0_45] : memref<480x128xf32, #tpu.memory_space<vmem>>, vector<4x32xf32>
    %cst_46 = arith.constant dense<0.000000e+00> : vector<32x32xf32>
    %105 = tpu.matmul %103, %104, %cst_46 {dimension_numbers = #tpu.dot_dimension_numbers<[1], [0], [0], [1], [0, 0, 1, 1], [], []>} : vector<32x4xf32>, vector<4x32xf32>, vector<32x32xf32> -> vector<32x32xf32>
    %106 = vector.extract_strided_slice %105 {offsets = [0, 0], sizes = [16, 32], strides = [1, 1]} : vector<32x32xf32> to vector<16x32xf32>
    %107 = arith.mulf %75, %106 : vector<16x32xf32>
    %108 = vector.extract_strided_slice %105 {offsets = [16, 0], sizes = [16, 32], strides = [1, 1]} : vector<32x32xf32> to vector<16x32xf32>
    %109 = arith.addf %107, %108 : vector<16x32xf32>
    %cst_47 = arith.constant 0.000000e+00 : f32
    %110 = vector.broadcast %cst_47 : f32 to vector<16x32xf32>
    %111 = arith.cmpf oge, %109, %110 : vector<16x32xf32>
    %cst_48 = arith.constant 3.000000e-01 : f32
    %112 = vector.broadcast %cst_48 : f32 to vector<16x32xf32>
    %113 = arith.mulf %112, %109 : vector<16x32xf32>
    %114 = arith.select %111, %109, %113 : vector<16x32xi1>, vector<16x32xf32>
    %c384 = arith.constant 384 : index
    %c0_49 = arith.constant 0 : index
    %115 = vector.load %arg4[%c384, %c0_49] : memref<544x128xbf16, #tpu.memory_space<vmem>>, vector<24x16xbf16>
    %116 = arith.truncf %114 : vector<16x32xf32> to vector<16x32xbf16>
    %cst_50 = arith.constant dense<0.000000e+00> : vector<24x32xf32>
    %117 = tpu.matmul %115, %116, %cst_50 {dimension_numbers = #tpu.dot_dimension_numbers<[1], [0], [0], [1], [0, 0, 1, 1], [], []>} : vector<24x16xbf16>, vector<16x32xbf16>, vector<24x32xf32> -> vector<24x32xf32>
    %118 = vector.extract_strided_slice %117 {offsets = [0, 0], sizes = [8, 32], strides = [1, 1]} : vector<24x32xf32> to vector<8x32xf32>
    %119 = arith.truncf %118 : vector<8x32xf32> to vector<8x32xbf16>
    %c416 = arith.constant 416 : index
    %c0_51 = arith.constant 0 : index
    %120 = vector.load %arg4[%c416, %c0_51] : memref<544x128xbf16, #tpu.memory_space<vmem>>, vector<32x32xbf16>
    %cst_52 = arith.constant dense<0.000000e+00> : vector<8x32xf32>
    %121 = tpu.matmul %119, %120, %cst_52 {dimension_numbers = #tpu.dot_dimension_numbers<[1], [0], [0], [1], [0, 0, 1, 1], [], []>} : vector<8x32xbf16>, vector<32x32xbf16>, vector<8x32xf32> -> vector<8x32xf32>
    %122 = vector.extract_strided_slice %117 {offsets = [8, 0], sizes = [8, 32], strides = [1, 1]} : vector<24x32xf32> to vector<8x32xf32>
    %123 = arith.truncf %122 : vector<8x32xf32> to vector<8x32xbf16>
    %c448 = arith.constant 448 : index
    %c0_53 = arith.constant 0 : index
    %124 = vector.load %arg4[%c448, %c0_53] : memref<544x128xbf16, #tpu.memory_space<vmem>>, vector<32x32xbf16>
    %cst_54 = arith.constant dense<0.000000e+00> : vector<8x32xf32>
    %125 = tpu.matmul %123, %124, %cst_54 {dimension_numbers = #tpu.dot_dimension_numbers<[1], [0], [0], [1], [0, 0, 1, 1], [], []>} : vector<8x32xbf16>, vector<32x32xbf16>, vector<8x32xf32> -> vector<8x32xf32>
    %126 = arith.addf %121, %125 : vector<8x32xf32>
    %127 = vector.extract_strided_slice %117 {offsets = [16, 0], sizes = [8, 32], strides = [1, 1]} : vector<24x32xf32> to vector<8x32xf32>
    %128 = arith.truncf %127 : vector<8x32xf32> to vector<8x32xbf16>
    %c480 = arith.constant 480 : index
    %c0_55 = arith.constant 0 : index
    %129 = vector.load %arg4[%c480, %c0_55] : memref<544x128xbf16, #tpu.memory_space<vmem>>, vector<32x32xbf16>
    %cst_56 = arith.constant dense<0.000000e+00> : vector<8x32xf32>
    %130 = tpu.matmul %128, %129, %cst_56 {dimension_numbers = #tpu.dot_dimension_numbers<[1], [0], [0], [1], [0, 0, 1, 1], [], []>} : vector<8x32xbf16>, vector<32x32xbf16>, vector<8x32xf32> -> vector<8x32xf32>
    %131 = arith.addf %126, %130 : vector<8x32xf32>
    %132 = arith.mulf %131, %131 : vector<8x32xf32>
    %133 = tpu.concatenate %131, %132 in 0 : vector<8x32xf32>, vector<8x32xf32> -> vector<16x32xf32>
    %c272 = arith.constant 272 : index
    %c0_57 = arith.constant 0 : index
    %134 = vector.load %arg3[%c272, %c0_57] : memref<480x128xf32, #tpu.memory_space<vmem>>, vector<4x16xf32>
    %cst_58 = arith.constant dense<0.000000e+00> : vector<4x32xf32>
    %135 = tpu.matmul %134, %133, %cst_58 {dimension_numbers = #tpu.dot_dimension_numbers<[1], [0], [0], [1], [0, 0, 1, 1], [], []>} : vector<4x16xf32>, vector<16x32xf32>, vector<4x32xf32> -> vector<4x32xf32>
    %c296 = arith.constant 296 : index
    %c0_59 = arith.constant 0 : index
    %136 = vector.load %arg3[%c296, %c0_59] : memref<480x128xf32, #tpu.memory_space<vmem>>, vector<32x8xf32>
    %cst_60 = arith.constant dense<0.000000e+00> : vector<4x8xf32>
    %137 = tpu.matmul %135, %136, %cst_60 {dimension_numbers = #tpu.dot_dimension_numbers<[1], [0], [0], [1], [0, 0, 1, 1], [], []>} : vector<4x32xf32>, vector<32x8xf32>, vector<4x8xf32> -> vector<4x8xf32>
    %138 = vector.extract_strided_slice %137 {offsets = [0, 0], sizes = [2, 8], strides = [1, 1]} : vector<4x8xf32> to vector<2x8xf32>
    %cst_61 = arith.constant 6.250000e-02 : f32
    %139 = vector.broadcast %cst_61 : f32 to vector<2x8xf32>
    %140 = arith.mulf %138, %139 : vector<2x8xf32>
    %141 = vector.extract_strided_slice %137 {offsets = [2, 0], sizes = [2, 8], strides = [1, 1]} : vector<4x8xf32> to vector<2x8xf32>
    %cst_62 = arith.constant 6.250000e-02 : f32
    %142 = vector.broadcast %cst_62 : f32 to vector<2x8xf32>
    %143 = arith.mulf %141, %142 : vector<2x8xf32>
    %144 = arith.mulf %140, %140 : vector<2x8xf32>
    %145 = arith.subf %143, %144 : vector<2x8xf32>
    %c336 = arith.constant 336 : index
    %c0_63 = arith.constant 0 : index
    %146 = vector.load %arg3[%c336, %c0_63] : memref<480x128xf32, #tpu.memory_space<vmem>>, vector<2x8xf32>
    %147 = vector.extract_strided_slice %146 {offsets = [0, 0], sizes = [1, 8], strides = [1, 1]} : vector<2x8xf32> to vector<1x8xf32>
    %cst_64 = arith.constant 9.99999974E-6 : f32
    %148 = vector.broadcast %cst_64 : f32 to vector<2x8xf32>
    %149 = arith.addf %145, %148 : vector<2x8xf32>
    %150 = math.rsqrt %149 : vector<2x8xf32>
    %151 = vector.broadcast %147 : vector<1x8xf32> to vector<2x8xf32>
    %152 = arith.mulf %151, %150 : vector<2x8xf32>
    %153 = vector.extract_strided_slice %146 {offsets = [1, 0], sizes = [1, 8], strides = [1, 1]} : vector<2x8xf32> to vector<1x8xf32>
    %154 = arith.mulf %140, %152 : vector<2x8xf32>
    %155 = vector.broadcast %153 : vector<1x8xf32> to vector<2x8xf32>
    %156 = arith.subf %155, %154 : vector<2x8xf32>
    %c280 = arith.constant 280 : index
    %c0_65 = arith.constant 0 : index
    %157 = vector.load %arg3[%c280, %c0_65] : memref<480x128xf32, #tpu.memory_space<vmem>>, vector<16x4xf32>
    %158 = tpu.concatenate %152, %156 in 0 : vector<2x8xf32>, vector<2x8xf32> -> vector<4x8xf32>
    %cst_66 = arith.constant dense<0.000000e+00> : vector<16x8xf32>
    %159 = tpu.matmul %157, %158, %cst_66 {dimension_numbers = #tpu.dot_dimension_numbers<[1], [0], [0], [1], [0, 0, 1, 1], [], []>} : vector<16x4xf32>, vector<4x8xf32>, vector<16x8xf32> -> vector<16x8xf32>
    %c328 = arith.constant 328 : index
    %c0_67 = arith.constant 0 : index
    %160 = vector.load %arg3[%c328, %c0_67] : memref<480x128xf32, #tpu.memory_space<vmem>>, vector<8x32xf32>
    %cst_68 = arith.constant dense<0.000000e+00> : vector<16x32xf32>
    %161 = tpu.matmul %159, %160, %cst_68 {dimension_numbers = #tpu.dot_dimension_numbers<[1], [0], [0], [1], [0, 0, 1, 1], [], []>} : vector<16x8xf32>, vector<8x32xf32>, vector<16x32xf32> -> vector<16x32xf32>
    %162 = vector.extract_strided_slice %161 {offsets = [0, 0], sizes = [8, 32], strides = [1, 1]} : vector<16x32xf32> to vector<8x32xf32>
    %163 = arith.mulf %131, %162 : vector<8x32xf32>
    %164 = vector.extract_strided_slice %161 {offsets = [8, 0], sizes = [8, 32], strides = [1, 1]} : vector<16x32xf32> to vector<8x32xf32>
    %165 = arith.addf %163, %164 : vector<8x32xf32>
    %cst_69 = arith.constant 0.000000e+00 : f32
    %166 = vector.broadcast %cst_69 : f32 to vector<8x32xf32>
    %167 = arith.cmpf oge, %165, %166 : vector<8x32xf32>
    %cst_70 = arith.constant 3.000000e-01 : f32
    %168 = vector.broadcast %cst_70 : f32 to vector<8x32xf32>
    %169 = arith.mulf %168, %165 : vector<8x32xf32>
    %170 = arith.select %167, %165, %169 : vector<8x32xi1>, vector<8x32xf32>
    %171 = arith.truncf %170 : vector<8x32xf32> to vector<8x32xbf16>
    %c512 = arith.constant 512 : index
    %c0_71 = arith.constant 0 : index
    %172 = vector.load %arg4[%c512, %c0_71] : memref<544x128xbf16, #tpu.memory_space<vmem>>, vector<32x48xbf16>
    %cst_72 = arith.constant dense<0.000000e+00> : vector<8x48xf32>
    %173 = tpu.matmul %171, %172, %cst_72 {dimension_numbers = #tpu.dot_dimension_numbers<[1], [0], [0], [1], [0, 0, 1, 1], [], []>} : vector<8x32xbf16>, vector<32x48xbf16>, vector<8x48xf32> -> vector<8x48xf32>
    %c360 = arith.constant 360 : index
    %c0_73 = arith.constant 0 : index
    %174 = vector.load %arg3[%c360, %c0_73] : memref<480x128xf32, #tpu.memory_space<vmem>>, vector<1x48xf32>
    %175 = vector.broadcast %174 : vector<1x48xf32> to vector<8x48xf32>
    %176 = arith.addf %173, %175 : vector<8x48xf32>
    %c344 = arith.constant 344 : index
    %c0_74 = arith.constant 0 : index
    %177 = vector.load %arg3[%c344, %c0_74] : memref<480x128xf32, #tpu.memory_space<vmem>>, vector<16x48xf32>
    %c368 = arith.constant 368 : index
    %c0_75 = arith.constant 0 : index
    %178 = vector.load %arg3[%c368, %c0_75] : memref<480x128xf32, #tpu.memory_space<vmem>>, vector<1x48xf32>
    %cst_76 = arith.constant 0.000000e+00 : f32
    %179 = vector.broadcast %cst_76 : f32 to vector<2x16xf32>
    %180 = vector.extract_strided_slice %176 {offsets = [0, 0], sizes = [2, 48], strides = [1, 1]} : vector<8x48xf32> to vector<2x48xf32>
    %cst_77 = arith.constant dense<0.000000e+00> : vector<2x48xf32>
    %181 = tpu.matmul %179, %177, %cst_77 {dimension_numbers = #tpu.dot_dimension_numbers<[1], [0], [0], [1], [0, 0, 1, 1], [], []>} : vector<2x16xf32>, vector<16x48xf32>, vector<2x48xf32> -> vector<2x48xf32>
    %182 = vector.broadcast %178 : vector<1x48xf32> to vector<2x48xf32>
    %183 = arith.addf %181, %182 : vector<2x48xf32>
    %184 = vector.extract_strided_slice %180 {offsets = [0, 0], sizes = [2, 16], strides = [1, 1]} : vector<2x48xf32> to vector<2x16xf32>
    %185 = vector.extract_strided_slice %183 {offsets = [0, 0], sizes = [2, 16], strides = [1, 1]} : vector<2x48xf32> to vector<2x16xf32>
    %186 = arith.addf %184, %185 : vector<2x16xf32>
    %187 = arith.negf %186 : vector<2x16xf32>
    %188 = math.exp %187 : vector<2x16xf32>
    %cst_78 = arith.constant 1.000000e+00 : f32
    %189 = vector.broadcast %cst_78 : f32 to vector<2x16xf32>
    %190 = arith.addf %189, %188 : vector<2x16xf32>
    %191 = arith.divf %189, %190 : vector<2x16xf32>
    %192 = vector.extract_strided_slice %180 {offsets = [0, 16], sizes = [2, 16], strides = [1, 1]} : vector<2x48xf32> to vector<2x16xf32>
    %193 = vector.extract_strided_slice %183 {offsets = [0, 16], sizes = [2, 16], strides = [1, 1]} : vector<2x48xf32> to vector<2x16xf32>
    %194 = arith.addf %192, %193 : vector<2x16xf32>
    %195 = arith.negf %194 : vector<2x16xf32>
    %196 = math.exp %195 : vector<2x16xf32>
    %cst_79 = arith.constant 1.000000e+00 : f32
    %197 = vector.broadcast %cst_79 : f32 to vector<2x16xf32>
    %198 = arith.addf %197, %196 : vector<2x16xf32>
    %199 = arith.divf %197, %198 : vector<2x16xf32>
    %200 = vector.extract_strided_slice %180 {offsets = [0, 32], sizes = [2, 16], strides = [1, 1]} : vector<2x48xf32> to vector<2x16xf32>
    %201 = vector.extract_strided_slice %183 {offsets = [0, 32], sizes = [2, 16], strides = [1, 1]} : vector<2x48xf32> to vector<2x16xf32>
    %202 = arith.mulf %191, %201 : vector<2x16xf32>
    %203 = arith.addf %200, %202 : vector<2x16xf32>
    %204 = math.tanh %203 : vector<2x16xf32>
    %cst_80 = arith.constant 1.000000e+00 : f32
    %205 = vector.broadcast %cst_80 : f32 to vector<2x16xf32>
    %206 = arith.subf %205, %199 : vector<2x16xf32>
    %207 = arith.mulf %206, %204 : vector<2x16xf32>
    %208 = arith.mulf %199, %179 : vector<2x16xf32>
    %209 = arith.addf %207, %208 : vector<2x16xf32>
    %c0_81 = arith.constant 0 : index
    %c0_82 = arith.constant 0 : index
    %210 = vector.load %arg2[%c0_81, %c0_82] : memref<8x1xf32, #tpu.memory_space<vmem>>, vector<2x1xf32>
    %211 = vector.broadcast %210 : vector<2x1xf32> to vector<2x16xf32>
    %212 = arith.mulf %211, %209 : vector<2x16xf32>
    %cst_83 = arith.constant 1.000000e+00 : f32
    %213 = vector.broadcast %cst_83 : f32 to vector<2x1xf32>
    %214 = arith.subf %213, %210 : vector<2x1xf32>
    %215 = vector.broadcast %214 : vector<2x1xf32> to vector<2x16xf32>
    %216 = arith.mulf %215, %179 : vector<2x16xf32>
    %217 = arith.addf %212, %216 : vector<2x16xf32>
    %218 = vector.extract_strided_slice %176 {offsets = [2, 0], sizes = [2, 48], strides = [1, 1]} : vector<8x48xf32> to vector<2x48xf32>
    %cst_84 = arith.constant dense<0.000000e+00> : vector<2x48xf32>
    %219 = tpu.matmul %217, %177, %cst_84 {dimension_numbers = #tpu.dot_dimension_numbers<[1], [0], [0], [1], [0, 0, 1, 1], [], []>} : vector<2x16xf32>, vector<16x48xf32>, vector<2x48xf32> -> vector<2x48xf32>
    %220 = vector.broadcast %178 : vector<1x48xf32> to vector<2x48xf32>
    %221 = arith.addf %219, %220 : vector<2x48xf32>
    %222 = vector.extract_strided_slice %218 {offsets = [0, 0], sizes = [2, 16], strides = [1, 1]} : vector<2x48xf32> to vector<2x16xf32>
    %223 = vector.extract_strided_slice %221 {offsets = [0, 0], sizes = [2, 16], strides = [1, 1]} : vector<2x48xf32> to vector<2x16xf32>
    %224 = arith.addf %222, %223 : vector<2x16xf32>
    %225 = arith.negf %224 : vector<2x16xf32>
    %226 = math.exp %225 : vector<2x16xf32>
    %cst_85 = arith.constant 1.000000e+00 : f32
    %227 = vector.broadcast %cst_85 : f32 to vector<2x16xf32>
    %228 = arith.addf %227, %226 : vector<2x16xf32>
    %229 = arith.divf %227, %228 : vector<2x16xf32>
    %230 = vector.extract_strided_slice %218 {offsets = [0, 16], sizes = [2, 16], strides = [1, 1]} : vector<2x48xf32> to vector<2x16xf32>
    %231 = vector.extract_strided_slice %221 {offsets = [0, 16], sizes = [2, 16], strides = [1, 1]} : vector<2x48xf32> to vector<2x16xf32>
    %232 = arith.addf %230, %231 : vector<2x16xf32>
    %233 = arith.negf %232 : vector<2x16xf32>
    %234 = math.exp %233 : vector<2x16xf32>
    %cst_86 = arith.constant 1.000000e+00 : f32
    %235 = vector.broadcast %cst_86 : f32 to vector<2x16xf32>
    %236 = arith.addf %235, %234 : vector<2x16xf32>
    %237 = arith.divf %235, %236 : vector<2x16xf32>
    %238 = vector.extract_strided_slice %218 {offsets = [0, 32], sizes = [2, 16], strides = [1, 1]} : vector<2x48xf32> to vector<2x16xf32>
    %239 = vector.extract_strided_slice %221 {offsets = [0, 32], sizes = [2, 16], strides = [1, 1]} : vector<2x48xf32> to vector<2x16xf32>
    %240 = arith.mulf %229, %239 : vector<2x16xf32>
    %241 = arith.addf %238, %240 : vector<2x16xf32>
    %242 = math.tanh %241 : vector<2x16xf32>
    %cst_87 = arith.constant 1.000000e+00 : f32
    %243 = vector.broadcast %cst_87 : f32 to vector<2x16xf32>
    %244 = arith.subf %243, %237 : vector<2x16xf32>
    %245 = arith.mulf %244, %242 : vector<2x16xf32>
    %246 = arith.mulf %237, %217 : vector<2x16xf32>
    %247 = arith.addf %245, %246 : vector<2x16xf32>
    %c2 = arith.constant 2 : index
    %c0_88 = arith.constant 0 : index
    %248 = vector.load %arg2[%c2, %c0_88] : memref<8x1xf32, #tpu.memory_space<vmem>>, vector<2x1xf32>
    %249 = vector.broadcast %248 : vector<2x1xf32> to vector<2x16xf32>
    %250 = arith.mulf %249, %247 : vector<2x16xf32>
    %cst_89 = arith.constant 1.000000e+00 : f32
    %251 = vector.broadcast %cst_89 : f32 to vector<2x1xf32>
    %252 = arith.subf %251, %248 : vector<2x1xf32>
    %253 = vector.broadcast %252 : vector<2x1xf32> to vector<2x16xf32>
    %254 = arith.mulf %253, %217 : vector<2x16xf32>
    %255 = arith.addf %250, %254 : vector<2x16xf32>
    %256 = vector.extract_strided_slice %176 {offsets = [4, 0], sizes = [2, 48], strides = [1, 1]} : vector<8x48xf32> to vector<2x48xf32>
    %cst_90 = arith.constant dense<0.000000e+00> : vector<2x48xf32>
    %257 = tpu.matmul %255, %177, %cst_90 {dimension_numbers = #tpu.dot_dimension_numbers<[1], [0], [0], [1], [0, 0, 1, 1], [], []>} : vector<2x16xf32>, vector<16x48xf32>, vector<2x48xf32> -> vector<2x48xf32>
    %258 = vector.broadcast %178 : vector<1x48xf32> to vector<2x48xf32>
    %259 = arith.addf %257, %258 : vector<2x48xf32>
    %260 = vector.extract_strided_slice %256 {offsets = [0, 0], sizes = [2, 16], strides = [1, 1]} : vector<2x48xf32> to vector<2x16xf32>
    %261 = vector.extract_strided_slice %259 {offsets = [0, 0], sizes = [2, 16], strides = [1, 1]} : vector<2x48xf32> to vector<2x16xf32>
    %262 = arith.addf %260, %261 : vector<2x16xf32>
    %263 = arith.negf %262 : vector<2x16xf32>
    %264 = math.exp %263 : vector<2x16xf32>
    %cst_91 = arith.constant 1.000000e+00 : f32
    %265 = vector.broadcast %cst_91 : f32 to vector<2x16xf32>
    %266 = arith.addf %265, %264 : vector<2x16xf32>
    %267 = arith.divf %265, %266 : vector<2x16xf32>
    %268 = vector.extract_strided_slice %256 {offsets = [0, 16], sizes = [2, 16], strides = [1, 1]} : vector<2x48xf32> to vector<2x16xf32>
    %269 = vector.extract_strided_slice %259 {offsets = [0, 16], sizes = [2, 16], strides = [1, 1]} : vector<2x48xf32> to vector<2x16xf32>
    %270 = arith.addf %268, %269 : vector<2x16xf32>
    %271 = arith.negf %270 : vector<2x16xf32>
    %272 = math.exp %271 : vector<2x16xf32>
    %cst_92 = arith.constant 1.000000e+00 : f32
    %273 = vector.broadcast %cst_92 : f32 to vector<2x16xf32>
    %274 = arith.addf %273, %272 : vector<2x16xf32>
    %275 = arith.divf %273, %274 : vector<2x16xf32>
    %276 = vector.extract_strided_slice %256 {offsets = [0, 32], sizes = [2, 16], strides = [1, 1]} : vector<2x48xf32> to vector<2x16xf32>
    %277 = vector.extract_strided_slice %259 {offsets = [0, 32], sizes = [2, 16], strides = [1, 1]} : vector<2x48xf32> to vector<2x16xf32>
    %278 = arith.mulf %267, %277 : vector<2x16xf32>
    %279 = arith.addf %276, %278 : vector<2x16xf32>
    %280 = math.tanh %279 : vector<2x16xf32>
    %cst_93 = arith.constant 1.000000e+00 : f32
    %281 = vector.broadcast %cst_93 : f32 to vector<2x16xf32>
    %282 = arith.subf %281, %275 : vector<2x16xf32>
    %283 = arith.mulf %282, %280 : vector<2x16xf32>
    %284 = arith.mulf %275, %255 : vector<2x16xf32>
    %285 = arith.addf %283, %284 : vector<2x16xf32>
    %c4 = arith.constant 4 : index
    %c0_94 = arith.constant 0 : index
    %286 = vector.load %arg2[%c4, %c0_94] : memref<8x1xf32, #tpu.memory_space<vmem>>, vector<2x1xf32>
    %287 = vector.broadcast %286 : vector<2x1xf32> to vector<2x16xf32>
    %288 = arith.mulf %287, %285 : vector<2x16xf32>
    %cst_95 = arith.constant 1.000000e+00 : f32
    %289 = vector.broadcast %cst_95 : f32 to vector<2x1xf32>
    %290 = arith.subf %289, %286 : vector<2x1xf32>
    %291 = vector.broadcast %290 : vector<2x1xf32> to vector<2x16xf32>
    %292 = arith.mulf %291, %255 : vector<2x16xf32>
    %293 = arith.addf %288, %292 : vector<2x16xf32>
    %294 = vector.extract_strided_slice %176 {offsets = [6, 0], sizes = [2, 48], strides = [1, 1]} : vector<8x48xf32> to vector<2x48xf32>
    %cst_96 = arith.constant dense<0.000000e+00> : vector<2x48xf32>
    %295 = tpu.matmul %293, %177, %cst_96 {dimension_numbers = #tpu.dot_dimension_numbers<[1], [0], [0], [1], [0, 0, 1, 1], [], []>} : vector<2x16xf32>, vector<16x48xf32>, vector<2x48xf32> -> vector<2x48xf32>
    %296 = vector.broadcast %178 : vector<1x48xf32> to vector<2x48xf32>
    %297 = arith.addf %295, %296 : vector<2x48xf32>
    %298 = vector.extract_strided_slice %294 {offsets = [0, 0], sizes = [2, 16], strides = [1, 1]} : vector<2x48xf32> to vector<2x16xf32>
    %299 = vector.extract_strided_slice %297 {offsets = [0, 0], sizes = [2, 16], strides = [1, 1]} : vector<2x48xf32> to vector<2x16xf32>
    %300 = arith.addf %298, %299 : vector<2x16xf32>
    %301 = arith.negf %300 : vector<2x16xf32>
    %302 = math.exp %301 : vector<2x16xf32>
    %cst_97 = arith.constant 1.000000e+00 : f32
    %303 = vector.broadcast %cst_97 : f32 to vector<2x16xf32>
    %304 = arith.addf %303, %302 : vector<2x16xf32>
    %305 = arith.divf %303, %304 : vector<2x16xf32>
    %306 = vector.extract_strided_slice %294 {offsets = [0, 16], sizes = [2, 16], strides = [1, 1]} : vector<2x48xf32> to vector<2x16xf32>
    %307 = vector.extract_strided_slice %297 {offsets = [0, 16], sizes = [2, 16], strides = [1, 1]} : vector<2x48xf32> to vector<2x16xf32>
    %308 = arith.addf %306, %307 : vector<2x16xf32>
    %309 = arith.negf %308 : vector<2x16xf32>
    %310 = math.exp %309 : vector<2x16xf32>
    %cst_98 = arith.constant 1.000000e+00 : f32
    %311 = vector.broadcast %cst_98 : f32 to vector<2x16xf32>
    %312 = arith.addf %311, %310 : vector<2x16xf32>
    %313 = arith.divf %311, %312 : vector<2x16xf32>
    %314 = vector.extract_strided_slice %294 {offsets = [0, 32], sizes = [2, 16], strides = [1, 1]} : vector<2x48xf32> to vector<2x16xf32>
    %315 = vector.extract_strided_slice %297 {offsets = [0, 32], sizes = [2, 16], strides = [1, 1]} : vector<2x48xf32> to vector<2x16xf32>
    %316 = arith.mulf %305, %315 : vector<2x16xf32>
    %317 = arith.addf %314, %316 : vector<2x16xf32>
    %318 = math.tanh %317 : vector<2x16xf32>
    %cst_99 = arith.constant 1.000000e+00 : f32
    %319 = vector.broadcast %cst_99 : f32 to vector<2x16xf32>
    %320 = arith.subf %319, %313 : vector<2x16xf32>
    %321 = arith.mulf %320, %318 : vector<2x16xf32>
    %322 = arith.mulf %313, %293 : vector<2x16xf32>
    %323 = arith.addf %321, %322 : vector<2x16xf32>
    %c6 = arith.constant 6 : index
    %c0_100 = arith.constant 0 : index
    %324 = vector.load %arg2[%c6, %c0_100] : memref<8x1xf32, #tpu.memory_space<vmem>>, vector<2x1xf32>
    %325 = vector.broadcast %324 : vector<2x1xf32> to vector<2x16xf32>
    %326 = arith.mulf %325, %323 : vector<2x16xf32>
    %cst_101 = arith.constant 1.000000e+00 : f32
    %327 = vector.broadcast %cst_101 : f32 to vector<2x1xf32>
    %328 = arith.subf %327, %324 : vector<2x1xf32>
    %329 = vector.broadcast %328 : vector<2x1xf32> to vector<2x16xf32>
    %330 = arith.mulf %329, %293 : vector<2x16xf32>
    %331 = arith.addf %326, %330 : vector<2x16xf32>
    %c376 = arith.constant 376 : index
    %c0_102 = arith.constant 0 : index
    %332 = vector.load %arg3[%c376, %c0_102] : memref<480x128xf32, #tpu.memory_space<vmem>>, vector<16x32xf32>
    %cst_103 = arith.constant dense<0.000000e+00> : vector<2x32xf32>
    %333 = tpu.matmul %331, %332, %cst_103 {dimension_numbers = #tpu.dot_dimension_numbers<[1], [0], [0], [1], [0, 0, 1, 1], [], []>} : vector<2x16xf32>, vector<16x32xf32>, vector<2x32xf32> -> vector<2x32xf32>
    %c392 = arith.constant 392 : index
    %c0_104 = arith.constant 0 : index
    %334 = vector.load %arg3[%c392, %c0_104] : memref<480x128xf32, #tpu.memory_space<vmem>>, vector<1x32xf32>
    %335 = vector.broadcast %334 : vector<1x32xf32> to vector<2x32xf32>
    %336 = arith.addf %333, %335 : vector<2x32xf32>
    %c400 = arith.constant 400 : index
    %c0_105 = arith.constant 0 : index
    %337 = vector.load %arg3[%c400, %c0_105] : memref<480x128xf32, #tpu.memory_space<vmem>>, vector<32x8xf32>
    %cst_106 = arith.constant dense<0.000000e+00> : vector<2x8xf32>
    %338 = tpu.matmul %336, %337, %cst_106 {dimension_numbers = #tpu.dot_dimension_numbers<[1], [0], [0], [1], [0, 0, 1, 1], [], []>} : vector<2x32xf32>, vector<32x8xf32>, vector<2x8xf32> -> vector<2x8xf32>
    %cst_107 = arith.constant dense<0xFF800000> : vector<2xf32>
    %339 = vector.multi_reduction <maximumf>, %338, %cst_107 [1] : vector<2x8xf32> to vector<2xf32>
    %340 = vector.shape_cast %339 : vector<2xf32> to vector<2x1xf32>
    %341 = vector.broadcast %340 : vector<2x1xf32> to vector<2x8xf32>
    %342 = arith.subf %338, %341 : vector<2x8xf32>
    %343 = math.exp %342 : vector<2x8xf32>
    %cst_108 = arith.constant dense<0.000000e+00> : vector<2xf32>
    %344 = vector.multi_reduction <add>, %343, %cst_108 [1] : vector<2x8xf32> to vector<2xf32>
    %345 = vector.shape_cast %344 : vector<2xf32> to vector<2x1xf32>
    %346 = vector.broadcast %345 : vector<2x1xf32> to vector<2x8xf32>
    %347 = arith.divf %343, %346 : vector<2x8xf32>
    %c432 = arith.constant 432 : index
    %c0_109 = arith.constant 0 : index
    %348 = vector.load %arg3[%c432, %c0_109] : memref<480x128xf32, #tpu.memory_space<vmem>>, vector<8x32xf32>
    %cst_110 = arith.constant dense<0.000000e+00> : vector<2x32xf32>
    %349 = tpu.matmul %347, %348, %cst_110 {dimension_numbers = #tpu.dot_dimension_numbers<[1], [0], [0], [1], [0, 0, 1, 1], [], []>} : vector<2x8xf32>, vector<8x32xf32>, vector<2x32xf32> -> vector<2x32xf32>
    %c440 = arith.constant 440 : index
    %c0_111 = arith.constant 0 : index
    %350 = vector.load %arg3[%c440, %c0_111] : memref<480x128xf32, #tpu.memory_space<vmem>>, vector<32x24xf32>
    %cst_112 = arith.constant dense<0.000000e+00> : vector<2x24xf32>
    %351 = tpu.matmul %349, %350, %cst_112 {dimension_numbers = #tpu.dot_dimension_numbers<[1], [0], [0], [1], [0, 0, 1, 1], [], []>} : vector<2x32xf32>, vector<32x24xf32>, vector<2x24xf32> -> vector<2x24xf32>
    %c472 = arith.constant 472 : index
    %c0_113 = arith.constant 0 : index
    %352 = vector.load %arg3[%c472, %c0_113] : memref<480x128xf32, #tpu.memory_space<vmem>>, vector<1x24xf32>
    %353 = vector.broadcast %352 : vector<1x24xf32> to vector<2x24xf32>
    %354 = arith.addf %351, %353 : vector<2x24xf32>
    %c0_114 = arith.constant 0 : index
    %c0_115 = arith.constant 0 : index
    %355 = vector.load %arg5[%c0_114, %c0_115] : memref<2x24xf32, #tpu.memory_space<vmem>>, vector<2x24xf32>
    tpu.vector_store %arg5[%c0_114, %c0_115], %354 {strides = array<i32>} : memref<2x24xf32, #tpu.memory_space<vmem>>, vector<2x24xf32>,
    return
  }
  func.func @transform_0(%arg0: i32) -> (i32, i32) {
    %c0_i32 = arith.constant 0 : i32
    %c0_i32_0 = arith.constant 0 : i32
    %c0_i32_1 = arith.constant 0 : i32
    return %c0_i32, %c0_i32_0 : i32, i32
  }
  func.func @transform_1(%arg0: i32) -> (i32, i32) {
    %c0_i32 = arith.constant 0 : i32
    %c0_i32_0 = arith.constant 0 : i32
    %c0_i32_1 = arith.constant 0 : i32
    return %c0_i32, %c0_i32_0 : i32, i32
  }
  func.func @transform_2(%arg0: i32) -> (i32, i32) {
    %c0_i32 = arith.constant 0 : i32
    %c0_i32_0 = arith.constant 0 : i32
    %c0_i32_1 = arith.constant 0 : i32
    return %c0_i32, %c0_i32_0 : i32, i32
  }
  func.func @transform_3(%arg0: i32) -> (i32, i32) {
    %c0_i32 = arith.constant 0 : i32
    %c0_i32_0 = arith.constant 0 : i32
    %c0_i32_1 = arith.constant 0 : i32
    return %c0_i32, %c0_i32_0 : i32, i32
  }
  func.func @transform_4(%arg0: i32) -> (i32, i32) {
    %c0_i32 = arith.constant 0 : i32
    %c0_i32_0 = arith.constant 0 : i32
    %c0_i32_1 = arith.constant 0 : i32
    return %c0_i32, %c0_i32_0 : i32, i32
  }
}

</mosaic_0001>

<bundles_post_ra>
// kernel: tpu_custom_call.1
= control target key start
LH: loop header
LB: loop body
LE: loop exit
PB: predicated region body
PF: predicated region fallthrough
CT: control target
= control target key end

     0   :  { %9 = vsyncpa [#allocation3], 0  ;;  %s4207_s0 = inlined_call_operand.vmem [shape: f32[32,16], index: 0, kind: input, shape index: {}]   ;;  %s4208_s1 = inlined_call_operand.vmem [shape: f32[8,1], index: 1, kind: input, shape index: {}]   ;;  %s4209_s2 = inlined_call_operand.hbm [shape: f32[480,128], index: 2, kind: input, shape index: {}]   ;;  %s4210_s3 = inlined_call_operand.hbm [shape: bf16[544,128], index: 3, kind: input, shape index: {}]   ;;  %s4211_s4 = inlined_call_operand.hbm [shape: f32[2,24], index: 4, kind: output, shape index: {}]  }
   0x1   :  { %10 = vsyncpa [#allocation6], 0 }
   0x2   :  { %11 = vsyncpa [#allocation4], 0  ;;  %s3842_s15 = smov [#allocation2]  }
   0x3   :  { %s21_s16 = sshll.u32 %s3842_s15, 4  ;;  %s22_s16 = int_to_ptr.vmem [resolvable:$true] %s21_s16 }
   0x4   :  { %s3784_s17 = scalar_lea.vmem %s22_s16, 7680  ;;  %p3789_p1 = scmp.lt.s32.totalorder %s22_s16, %s22_s16 }
   0x5   :  { %p3785_p0 = scmp.ne.s32.totalorder %s22_s16, %s3784_s17  ;;  %p3790_p2 = scmp.lt.s32.totalorder %s3784_s17, %s3784_s17 }
   0x7   :  { %p3791_p3 = por %p3790_p2, %p3789_p1 }
   0x9   :  { %p3792_p4 = pnand %p3791_p3, %p3785_p0 }
   0xb   :  { %3795 = shalt.err (!%p3792_p4)
}
   0xc   :  { %s3843_s18 = smov 128   ;;  %s3844_s19 = smov 8  }
   0xd   :  { %27 = dma.hbm_to_vmem [thread:$0]  %s4209_s2, 7680, %s22_s16, [#allocation3], %s3843_s18, %s3843_s18, %s3844_s19  }
   0xe   :  { %s3845_s22 = smov [#allocation5]  }
   0xf   :  { %s33_s23 = sshll.u32 %s3845_s22, 4  ;;  %s34_s23 = int_to_ptr.vmem [resolvable:$true] %s33_s23 }
  0x10   :  { %s3804_s24 = scalar_lea.vmem %s34_s23, 4352  ;;  %p3809_p6 = scmp.lt.s32.totalorder %s34_s23, %s34_s23 }
  0x11   :  { %p3805_p5 = scmp.ne.s32.totalorder %s34_s23, %s3804_s24  ;;  %p3810_p7 = scmp.lt.s32.totalorder %s3804_s24, %s3804_s24 }
  0x13   :  { %p3811_p8 = por %p3810_p7, %p3809_p6 }
  0x15   :  { %p3812_p9 = pnand %p3811_p8, %p3805_p5 }
  0x17   :  { %3815 = shalt.err (!%p3812_p9)
}
  0x18   :  { %s3846_s25 = smov 64   ;;  %s3847_s26 = smov 4  }
  0x19   :  { %39 = dma.hbm_to_vmem [thread:$0]  %s4210_s3, 4352, %s34_s23, [#allocation6], %s3846_s25, %s3846_s25, %s3847_s26  }
  0x1a   :  { %3836 = dma.done.wait [#allocation3], 7680  }
  0x1b   :  { %3837 = vsyncadd [#allocation3], 4294959616 }
  0x1c   :  { %3838 = dma.done.wait [#allocation6], 4352  }
  0x1d   :  { %3839 = vsyncadd [#allocation6], 4294962944  ;;  %v49_v0 = vld [vmem:[%s4207_s0 + $0x10] sm:$0xff]  ;;  %v50_v1 = vld [vmem:[%s4207_s0 + $0x18] sm:$0xff]  ;;  %vm95_vm0 = vcmask 261120   ;;  %vm209_vm1 = vcmask 130048  }
  0x1e   :  { %v47_v2 = vld [vmem:[%s4207_s0] sm:$0xff]  ;;  %v64_v3 = vpack.c.bf16 %v50_v1, %v49_v0  ;;  %v48_v4 = vld [vmem:[%s4207_s0 + $0x8] sm:$0xff]  ;;  %v3710_v8 = vld [vmem:[#allocation5 + $0x10] sm:$0xff]   ;;  %v3848_v33 = vmov 0.0   ;;  %vm3849_vm2 = vmmov 0   ;;  %vm408_vm3 = vcmask 523264  }
  0x1f   :  { %v63_v5 = vpack.c.bf16 %v48_v4, %v47_v2  ;;  %v3708_v6 = vld [vmem:[#allocation5] sm:$0xff]   ;;  %v3709_v7 = vld [vmem:[#allocation5 + $0x8] sm:$0xff]   ;;  %v3711_v9 = vld [vmem:[#allocation5 + $0x18] sm:$0xff]   ;;  %vm599_vm4 = vcmask 31744   ;;  %vm597_vm5 = vcmask 1041408   ;;  %vm624_vm6 = vcmask 1043456  }
  0x20   :  { %3372 = vmatprep.subr.bf16.mxu0 %v64_v3  ;;  %3376 = vmatprep.mubr.msk.bf16.mxu0 %vm95_vm0, %v3708_v6  ;;  %v3712_v10 = vld [vmem:[#allocation5 + $0x20] sm:$0xff]   ;;  %v3713_v11 = vld [vmem:[#allocation5 + $0x28] sm:$0xff]   ;;  %v3714_v12 = vld [vmem:[#allocation5 + $0x38] sm:$0xff]   ;;  %vm2116_vm13 = vcmask 64512   ;;  %s3850_s0 = smov 96   ;;  %s3852_s11 = smov 32  }
  0x21   :  { %3373 = vmatpush3.bf16.msra.mxu0 %v64_v3  ;;  %3388 = vmatprep.subr.bf16.mxu1 %v3714_v12  ;;  %v3715_v13 = vld [vmem:[#allocation5 + $0x30] sm:$0xff]   ;;  %v3716_v25 = vld [vmem:[#allocation5 + $0x40] sm:$0xff]   ;;  %v488_v35 = vld [vmem:[#allocation2 + $0x98] sm:$0xff]  ;;  %s3853_s12 = smov 112   ;;  %s3854_s17 = smov 16   ;;  %vm2925_vm15 = vcmask 58368  }
  0x22   :  { %3374 = vmatprep.subr.bf16.mxu0 %v63_v5  ;;  %3389 = vmatpush3.bf16.msra.mxu1 %v3714_v12  ;;  %v489_v34 = vld [vmem:[#allocation2 + $0xa0] sm:$0xff]  ;;  %v487_v36 = vld [vmem:[#allocation2 + $0x90] sm:$0xff]  ;;  %v486_v37 = vld [vmem:[#allocation2 + $0x88] sm:$0xff] }
  0x23   :  { %3394 = vmatprep.subr.bf16.mxu1 %v3715_v13  ;;  %v485_v38 = vld [vmem:[#allocation2 + $0x80] sm:$0xff]  ;;  %v484_v39 = vld [vmem:[#allocation2 + $0x78] sm:$0xff]  ;;  %v483_v40 = vld [vmem:[#allocation2 + $0x70] sm:$0xff] }
  0x24   :  { %v397_v54 = vld [vmem:[#allocation2 + $0x10] sm:$0xff]  ;;  %v398_v56 = vld [vmem:[#allocation2 + $0x18] sm:$0xff]  ;;  %v396_v61 = vld [vmem:[#allocation2 + $0x8] sm:$0xff] }
  0x25   :  { %3375 = vmatpush3.bf16.msra.mxu0 %v63_v5  ;;  %v395_v2 = vld [vmem:[#allocation2] sm:$0xff] }
  0x26   :  { %3406 = vmatprep.subr.mxu0 %v3848_v33 }
  0x28   :  { %3377 = vmatmul.mubr.msk.bf16.vlgmr.msra.gmra.mxu0 %vm95_vm0, %v3709_v7 }
  0x29   :  { %3380 = vmatprep.mubr.msk.bf16.mxu0 %vm95_vm0, %v3710_v8 }
  0x30   :  { %3381 = vmatmul.mubr.msk.bf16.gmra.mxu0 %vm95_vm0, %v3711_v9  ;;  %v407_v9 = vld [vmem:[#allocation2 + $0x20] sm:$0xf] }
  0x31   :  { %3384 = vmatprep.mubr.msk.bf16.mxu0 %vm95_vm0, %v3712_v10  ;;  %v482_v10 = vld [vmem:[#allocation2 + $0x68] sm:$0xff] }
  0x38   :  { %3385 = vmatmul.mubr.msk.bf16.gmra.mxu0 %vm95_vm0, %v3713_v11 }
  0x39   :  { %3422 = vmatprep.mubr.msk.f32.mxu0 %vm3849_vm2, %v3848_v33 }
  0xe8   :  { %v3378_v14 = vpop.f32.mrf.mxu0 }
  0xea   :  { %v148_v15 = vpop.f32.mrf.mxu0 }
  0xec   :  { %v3379_v16 = vpop.f32.mrf.mxu0 }
  0xed   :  { %v196_v31 = vpack.c.bf16 %v3379_v16, %v3378_v14  ;;  %v592_v14 = vld [vmem:[#allocation2 + $0x58] sm:$0xff] }
  0xee   :  { %v151_v17 = vpop.f32.mrf.mxu0 }
  0xef   :  { %v195_v26 = vpack.c.bf16 %v151_v17, %v148_v15 }
  0xf0   :  { %v3382_v18 = vpop.f32.mrf.mxu0 }
  0xf2   :  { %v164_v19 = vpop.f32.mrf.mxu0 }
  0xf4   :  { %v3383_v20 = vpop.f32.mrf.mxu0 }
  0xf5   :  { %v200_v23 = vpack.c.bf16 %v3383_v20, %v3382_v18 }
  0xf6   :  { %v167_v21 = vpop.f32.mrf.mxu0 }
  0xf7   :  { %v199_v22 = vpack.c.bf16 %v167_v21, %v164_v19 }
  0xf8   :  { %v3386_v24 = vpop.f32.mrf.mxu0 }
  0xf9   :  { %3390 = vmatprep.mubr.msk.bf16.mxu1 %vm209_vm1, %v199_v22  ;;  %v572_v22 = vlaneseq }
  0xfa   :  { %3391 = vmatmul.mubr.msk.bf16.vlgmr.msra.gmra.mxu1 %vm209_vm1, %v200_v23  ;;  %v180_v27 = vpop.f32.mrf.mxu0 }
  0xfb   :  { %3396 = vmatprep.mubr.msk.bf16.mxu1 %vm209_vm1, %v195_v26  ;;  %3395 = vmatpush3.bf16.msra.mxu1 %v3715_v13  ;;  %v586_v13 = vld [vmem:[#allocation2 + $0x28] sm:$0xff]  ;;  %v573_v23 = vshrl.u32 %v572_v22, 7  ;;  %v3726_v22 = vld [vmem:[#allocation5 + $0xb0] sm:$0xff]  }
  0xfc   :  { %v3387_v28 = vpop.f32.mrf.mxu0  ;;  %3400 = vmatprep.subr.bf16.mxu1 %v3716_v25 }
  0xfd   :  { %v327_v32 = vpack.c.bf16 %v3387_v28, %v3386_v24  ;;  %v3955_v24 = vsub.s32 0, %v573_v23 }
  0xfe   :  { %v183_v29 = vpop.f32.mrf.mxu0 }
  0xff   :  { %v326_v30 = vpack.c.bf16 %v183_v29, %v180_v27  ;;  %v3958_v27 = vsub.s32 1, %v573_v23  ;;  %v3728_v23 = vld [vmem:[#allocation5 + $0xa8] sm:$0xff]  }
 0x102   :  { %3397 = vmatmul.mubr.msk.bf16.vlgmr.msra.gmra.mxu1 %vm209_vm1, %v196_v31 }
 0x103   :  { %3402 = vmatprep.mubr.msk.bf16.mxu1 %vm209_vm1, %v326_v30  ;;  %3401 = vmatpush3.bf16.msra.mxu1 %v3716_v25  ;;  %v569_v25 = vld [vmem:[#allocation2 + $0xb0] sm:$0x3] }
 0x104   :  { %3425 = vmatprep.subr.mxu1 %v3848_v33  ;;  %v575_v26 = vrot.slane %v569_v25, %v3955_v24  ;;  %v584_v31 = vrot.slane %v569_v25, %v3958_v27  ;;  %v3730_v25 = vld [vmem:[#allocation5 + $0xa0] sm:$0xff]  }
 0x10a   :  { %3403 = vmatmul.mubr.msk.bf16.vlgmr.msra.gmra.mxu1 %vm209_vm1, %v327_v32 }
 0x10b   :  { %3441 = vmatprep.mubr.msk.f32.mxu1 %vm3849_vm2, %v3848_v33  ;;  %3426 = vmatpush3.msra.mxu1 %v489_v34 }
 0x10c   :  { %3427 = vmatprep.subr.mxu1 %v3848_v33 }
 0x10d   :  { %3428 = vmatpush3.msra.mxu1 %v488_v35 }
 0x10e   :  { %3429 = vmatprep.subr.mxu1 %v3848_v33 }
 0x10f   :  { %3430 = vmatpush3.msra.mxu1 %v487_v36 }
 0x110   :  { %3431 = vmatprep.subr.mxu1 %v3848_v33 }
 0x111   :  { %3432 = vmatpush3.msra.mxu1 %v486_v37  ;;  %v587_v37 = vld [vmem:[#allocation2 + $0x30] sm:$0xff] }
 0x112   :  { %3433 = vmatprep.subr.mxu1 %v3848_v33 }
 0x113   :  { %3434 = vmatpush3.msra.mxu1 %v485_v38  ;;  %v593_v38 = vld [vmem:[#allocation2 + $0x60] sm:$0xff] }
 0x114   :  { %3435 = vmatprep.subr.mxu1 %v3848_v33 }
 0x115   :  { %3436 = vmatpush3.msra.mxu1 %v484_v39  ;;  %v588_v39 = vld [vmem:[#allocation2 + $0x38] sm:$0xff] }
 0x116   :  { %3437 = vmatprep.subr.mxu1 %v3848_v33 }
 0x117   :  { %3438 = vmatpush3.msra.mxu1 %v483_v40  ;;  %v589_v40 = vld [vmem:[#allocation2 + $0x40] sm:$0xff] }
 0x118   :  { %3439 = vmatprep.subr.mxu1 %v3848_v33 }
 0x119   :  { %3440 = vmatpush3.msra.mxu1 %v482_v10 }
 0x1ba   :  { %v3392_v41 = vpop.f32.mrf.mxu1 }
 0x1bc   :  { %v250_v42 = vpop.f32.mrf.mxu1 }
 0x1be   :  { %v3393_v43 = vpop.f32.mrf.mxu1 }
 0x1c0   :  { %v253_v44 = vpop.f32.mrf.mxu1 }
 0x1c2   :  { %v3398_v45 = vpop.f32.mrf.mxu1 }
 0x1c3   :  { %v320_v50 = vadd.f32 %v3398_v45, %v3392_v41  ;;  %v590_v41 = vld [vmem:[#allocation2 + $0x48] sm:$0xff] }
 0x1c4   :  { %v311_v46 = vpop.f32.mrf.mxu1 }
 0x1c5   :  { %v312_v57 = vadd.f32 %v311_v46, %v250_v42  ;;  %v591_v42 = vld [vmem:[#allocation2 + $0x50] sm:$0xff] }
 0x1c6   :  { %v3399_v47 = vpop.f32.mrf.mxu1 }
 0x1c7   :  { %v323_v52 = vadd.f32 %v3399_v47, %v3393_v43  ;;  %v733_v43 = vld [vmem:[#allocation2 + $0xa8] sm:$0xf] }
 0x1c8   :  { %v314_v48 = vpop.f32.mrf.mxu1 }
 0x1c9   :  { %v315_v58 = vadd.f32 %v314_v48, %v253_v44 }
 0x1ca   :  { %v3404_v49 = vpop.f32.mrf.mxu1 }
 0x1cb   :  { %v393_v53 = vadd.f32 %v3404_v49, %v320_v50 }
 0x1cc   :  { %v376_v51 = vpop.f32.mrf.mxu1 }
 0x1cd   :  { %v3924_v62 = vadd.f32 %v397_v54, %v393_v53  ;;  %v391_v63 = vadd.f32 %v376_v51, %v312_v57 }
 0x1ce   :  { %v3405_v55 = vpop.f32.mrf.mxu1 }
 0x1cf   :  { %v394_v59 = vadd.f32 %v3405_v55, %v323_v52  ;;  %v405_v5 = vmul.f32 %v3924_v62, %v3924_v62  ;;  %v3934_v6 = vadd.f32 %v395_v2, %v391_v63  ;;  %v3720_v52 = vld [vmem:[#allocation5 + $0x98] sm:$0xff]  }
 0x1d0   :  { %v379_v60 = vpop.f32.mrf.mxu1 }
 0x1d1   :  { %v3926_v0 = vadd.f32 %v398_v56, %v394_v59  ;;  %v392_v1 = vadd.f32 %v379_v60, %v315_v58  ;;  %v403_v8 = vmul.f32 %v3934_v6, %v3934_v6 }
 0x1d3   :  { %v406_v3 = vmul.f32 %v3926_v0, %v3926_v0  ;;  %v3930_v4 = vadd.f32 %v396_v61, %v392_v1 }
 0x1d5   :  { %3407 = vmatpush3.msra.mxu0 %v406_v3  ;;  %v404_v7 = vmul.f32 %v3930_v4, %v3930_v4 }
 0x1d6   :  { %3408 = vmatprep.subr.mxu0 %v3848_v33 }
 0x1d7   :  { %3409 = vmatpush3.msra.mxu0 %v405_v5 }
 0x1d8   :  { %3410 = vmatprep.subr.mxu0 %v3848_v33 }
 0x1d9   :  { %3411 = vmatpush3.msra.mxu0 %v404_v7 }
 0x1da   :  { %3412 = vmatprep.subr.mxu0 %v3848_v33 }
 0x1db   :  { %3413 = vmatpush3.msra.mxu0 %v403_v8 }
 0x1dc   :  { %3414 = vmatprep.subr.mxu0 %v3848_v33 }
 0x1dd   :  { %3415 = vmatpush3.msra.mxu0 %v3926_v0 }
 0x1de   :  { %3416 = vmatprep.subr.mxu0 %v3848_v33 }
 0x1df   :  { %3417 = vmatpush3.msra.mxu0 %v3924_v62 }
 0x1e0   :  { %3418 = vmatprep.subr.mxu0 %v3848_v33 }
 0x1e1   :  { %3419 = vmatpush3.msra.mxu0 %v3930_v4 }
 0x1e2   :  { %3420 = vmatprep.subr.mxu0 %v3848_v33 }
 0x1e3   :  { %3421 = vmatpush3.msra.mxu0 %v3934_v6 }
 0x1e4   :  { %3423 = vmatmul.mubr.msk.f32.vlgmr.msra.gmra.mxu0 %vm408_vm3, %v407_v9 }
 0x1e5   :  { %3446 = vmatprep.mubr.msk.f32.mxu0 %vm599_vm4, %v586_v13 }
 0x2a4   :  { %v478_v11 = vpop.f32.mrf.mxu0 }
 0x2a5   :  { %3442 = vmatmul.mubr.msk.f32.vlgmr.msra.gmra.mxu1 %vm408_vm3, %v478_v11 }
 0x2a6   :  { %v3424_v12 = vpop.f32.mrf.mxu0  ;;  %3455 = vmatprep.mubr.msk.f32.mxu1 %vm599_vm4, %v592_v14 }
 0x365   :  { %v559_v15 = vpop.f32.mrf.mxu1 }
 0x366   :  { %v563_v16 = vmul.f32 0.00390625, %v559_v15  ;;  %v3717_v15 = vld [vmem:[#allocation5 + $0x48] sm:$0xff]  }
 0x367   :  { %v3443_v17 = vpop.f32.mrf.mxu1 }
 0x368   :  { %v564_v18 = vmul.f32 %v563_v16, %v563_v16  ;;  %v3719_v17 = vld [vmem:[#allocation5 + $0x58] sm:$0xff]  }
 0x36a   :  { %v566_v19 = vrot.slane %v564_v18, 6  ;;  %v3721_v18 = vld [vmem:[#allocation5 + $0x90] sm:$0xff]  }
 0x36c   :  { %v568_v20 = vsub.f32 %v563_v16, %v566_v19  ;;  %v3722_v19 = vld [vmem:[#allocation5 + $0x88] sm:$0xff]  }
 0x36e   :  { %v570_v21 = vadd.f32 1e-05, %v568_v20  ;;  %v3724_v20 = vld [vmem:[#allocation5 + $0xb8] sm:$0xff]  }
 0x370   :  { %3742 = vrsqrt.f32 %v570_v21  ;;  %v3723_v21 = vld [vmem:[#allocation5 + $0x80] sm:$0xff]  }
 0x37d   :  { %v3743_v28 = vpop.eup %3742 }
 0x37e   :  { %v576_v29 = vmul.f32 %v3743_v28, %v575_v26 }
 0x380   :  { %v578_v30 = vrot.slane %v576_v29, 2 }
 0x382   :  { %v580_v32 = vmul.f32 %v578_v30, %v563_v16  ;;  %v3718_v16 = vld [vmem:[#allocation5 + $0x50] sm:$0xff]  }
 0x384   :  { %v585_v34 = vsub.f32 %v584_v31, %v580_v32 }
 0x386   :  { %v595_v35 = vrot.slane %v585_v34, 6 }
 0x388   :  { %v598_v36 = vsel %vm597_vm5, %v578_v30, %v595_v35  ;;  %v3725_v35 = vld [vmem:[#allocation5 + $0x78] sm:$0xff]  }
 0x389   :  { %3444 = vmatprep.subr.msk.mxu0 %vm624_vm6, %v598_v36  ;;  %3690 = vmatprep.subr.msk.mxu1 %vm624_vm6, %v598_v36 }
 0x38a   :  { %3445 = vmatpush3.msk.msra.mxu0 %vm624_vm6, %v598_v36  ;;  %3691 = vmatpush3.msk.msra.mxu1 %vm624_vm6, %v598_v36 }
 0x38b   :  { %3447 = vmatmul.mubr.msk.f32.vlgmr.msra.gmra.mxu0 %vm599_vm4, %v587_v37  ;;  %3456 = vmatmul.mubr.msk.f32.vlgmr.msra.gmra.mxu1 %vm599_vm4, %v593_v38 }
 0x38c   :  { %3449 = vmatprep.mubr.msk.f32.mxu0 %vm599_vm4, %v588_v39  ;;  %3472 = vmatprep.subr.bf16.mxu0 %v3848_v33  ;;  %v3727_v39 = vld [vmem:[#allocation5 + $0x70] sm:$0xff]  }
 0x38d   :  { %3458 = vmatprep.subr.msk.mxu1 %vm624_vm6, %v733_v43 }
 0x38e   :  { %3459 = vmatpush3.msk.msra.mxu1 %vm624_vm6, %v733_v43 }
 0x38f   :  { %3450 = vmatmul.mubr.msk.f32.gmra.mxu0 %vm599_vm4, %v589_v40  ;;  %3488 = vmatprep.subr.bf16.mxu1 %v3848_v33 }
 0x390   :  { %3452 = vmatprep.mubr.msk.f32.mxu0 %vm599_vm4, %v590_v41 }
 0x393   :  { %3453 = vmatmul.mubr.msk.f32.gmra.mxu0 %vm599_vm4, %v591_v42  ;;  %v3729_v42 = vld [vmem:[#allocation5 + $0x68] sm:$0xff]  }
 0x394   :  { %3476 = vmatprep.mubr.msk.bf16.mxu0 %vm3849_vm2, %v3848_v33 }
 0x44b   :  { %v3448_v44 = vpop.f32.mrf.mxu0  ;;  %v3457_v48 = vpop.f32.mrf.mxu1 }
 0x44d   :  { %v694_v45 = vpop.f32.mrf.mxu0  ;;  %v724_v51 = vpop.f32.mrf.mxu1 }
 0x44e   :  { %3460 = vmatprep.mubr.msk.f32.mxu1 %vm599_vm4, %v694_v45  ;;  %v3731_v45 = vld [vmem:[#allocation5 + $0x60] sm:$0xff]  }
 0x44f   :  { %v3451_v46 = vpop.f32.mrf.mxu0  ;;  %3461 = vmatmul.mubr.msk.f32.vlgmr.msra.gmra.mxu1 %vm599_vm4, %v3448_v44 }
 0x450   :  { %3489 = vmatpush3.bf16.msra.mxu1 %v3720_v52 }
 0x451   :  { %v704_v47 = vpop.f32.mrf.mxu0  ;;  %3490 = vmatprep.subr.bf16.mxu1 %v3848_v33 }
 0x452   :  { %3463 = vmatprep.mubr.msk.f32.mxu1 %vm599_vm4, %v704_v47  ;;  %v1287_v47 = vld [vmem:[#allocation2 + $0xf8] sm:$0xff] }
 0x453   :  { %v3454_v49 = vpop.f32.mrf.mxu0  ;;  %3464 = vmatmul.mubr.msk.f32.gmra.mxu1 %vm599_vm4, %v3451_v46 }
 0x454   :  { %3491 = vmatpush3.bf16.msra.mxu1 %v3721_v18 }
 0x455   :  { %v714_v50 = vpop.f32.mrf.mxu0  ;;  %3492 = vmatprep.subr.bf16.mxu1 %v3848_v33 }
 0x456   :  { %3466 = vmatprep.mubr.msk.f32.mxu1 %vm599_vm4, %v714_v50 }
 0x457   :  { %3467 = vmatmul.mubr.msk.f32.gmra.mxu1 %vm599_vm4, %v3454_v49  ;;  %v1285_v49 = vld [vmem:[#allocation2 + $0xe8] sm:$0xff] }
 0x458   :  { %3469 = vmatprep.mubr.msk.f32.mxu1 %vm599_vm4, %v724_v51  ;;  %3493 = vmatpush3.bf16.msra.mxu1 %v3722_v19 }
 0x459   :  { %3494 = vmatprep.subr.bf16.mxu1 %v3848_v33 }
 0x45b   :  { %3470 = vmatmul.mubr.msk.f32.gmra.mxu1 %vm599_vm4, %v3457_v48  ;;  %v1286_v48 = vld [vmem:[#allocation2 + $0xf0] sm:$0xff] }
 0x45c   :  { %3496 = vmatprep.mubr.msk.bf16.mxu1 %vm3849_vm2, %v3848_v33  ;;  %3495 = vmatpush3.bf16.msra.mxu1 %v3723_v21 }
 0x45d   :  { %3500 = vmatprep.subr.bf16.mxu1 %v3848_v33 }
 0x50f   :  { %v3462_v53 = vpop.f32.mrf.mxu1 }
 0x510   :  { %v867_v63 = vmul.f32 %v3462_v53, %v3930_v4 }
 0x511   :  { %v827_v54 = vpop.f32.mrf.mxu1 }
 0x512   :  { %v866_v59 = vmul.f32 %v827_v54, %v3934_v6 }
 0x513   :  { %v3465_v55 = vpop.f32.mrf.mxu1 }
 0x514   :  { %v869_v60 = vmul.f32 %v3465_v55, %v3926_v0 }
 0x515   :  { %v837_v56 = vpop.f32.mrf.mxu1 }
 0x516   :  { %v868_v1 = vmul.f32 %v837_v56, %v3924_v62 }
 0x517   :  { %v3468_v57 = vpop.f32.mrf.mxu1 }
 0x518   :  { %v871_v7 = vadd.f32 %v3468_v57, %v867_v63 }
 0x519   :  { %v847_v58 = vpop.f32.mrf.mxu1 }
 0x51a   :  { %v870_v2 = vadd.f32 %v866_v59, %v847_v58  ;;  %v879_v12 = vmul.f32 0.3, %v871_v7  ;;  %vm875_vm10 = vcmp.ge.f32.partialorder %v871_v7, 0.0 }
 0x51b   :  { %v3471_v61 = vpop.f32.mrf.mxu1 }
 0x51c   :  { %v873_v3 = vadd.f32 %v3471_v61, %v869_v60  ;;  %v878_v10 = vmul.f32 0.3, %v870_v2  ;;  %vm874_vm9 = vcmp.ge.f32.partialorder %v870_v2, 0.0  ;;  %v883_v4 = vsel %vm875_vm10, %v871_v7, %v879_v12  ;;  %v1384_v12 = vld [vmem:[#allocation2 + $0xc0] sm:$0xff] }
 0x51d   :  { %v857_v5 = vpop.f32.mrf.mxu1 }
 0x51e   :  { %v881_v8 = vmul.f32 0.3, %v873_v3  ;;  %v872_v9 = vadd.f32 %v868_v1, %v857_v5  ;;  %vm877_vm7 = vcmp.ge.f32.partialorder %v873_v3, 0.0  ;;  %v882_v14 = vsel %vm874_vm9, %v870_v2, %v878_v10 }
 0x51f   :  { %v892_v62 = vpack.c.bf16 %v883_v4, %v882_v14 }
 0x520   :  { %vm876_vm8 = vcmp.ge.f32.partialorder %v872_v9, 0.0  ;;  %v880_v11 = vmul.f32 0.3, %v872_v9  ;;  %v885_v6 = vsel %vm877_vm7, %v873_v3, %v881_v8  ;;  %v1210_v8 = vld [vmem:[#allocation2 + $0xb8] sm:$0xf] }
 0x522   :  { %v884_v13 = vsel %vm876_vm8, %v872_v9, %v880_v11  ;;  %v1284_v9 = vld [vmem:[#allocation2 + $0xe0] sm:$0xff] }
 0x523   :  { %v893_v0 = vpack.c.bf16 %v885_v6, %v884_v13 }
 0x525   :  { %3473 = vmatpush3.bf16.msra.mxu0 %v893_v0 }
 0x526   :  { %3474 = vmatprep.subr.bf16.mxu0 %v3848_v33 }
 0x529   :  { %3475 = vmatpush3.bf16.msra.mxu0 %v892_v62 }
 0x52a   :  { %3512 = vmatprep.subr.bf16.mxu0 %v3848_v33 }
 0x52c   :  { %3477 = vmatmul.mubr.msk.bf16.vlgmr.msra.gmra.mxu0 %vm95_vm0, %v3717_v15 }
 0x52d   :  { %3480 = vmatprep.mubr.msk.bf16.mxu0 %vm3849_vm2, %v3848_v33  ;;  %3513 = vmatpush3.bf16.msra.mxu0 %v3724_v20 }
 0x52e   :  { %3514 = vmatprep.subr.bf16.mxu0 %v3848_v33 }
 0x531   :  { %3515 = vmatpush3.bf16.msra.mxu0 %v3726_v22 }
 0x532   :  { %3516 = vmatprep.subr.bf16.mxu0 %v3848_v33 }
 0x534   :  { %3481 = vmatmul.mubr.msk.bf16.gmra.mxu0 %vm95_vm0, %v3718_v16  ;;  %v1367_v16 = vld [vmem:[#allocation2 + $0x108] sm:$0x3] }
 0x535   :  { %3484 = vmatprep.mubr.msk.bf16.mxu0 %vm3849_vm2, %v3848_v33  ;;  %3517 = vmatpush3.bf16.msra.mxu0 %v3728_v23  ;;  %v1382_v21 = vrot.slane %v1367_v16, %v3958_v27 }
 0x536   :  { %3518 = vmatprep.subr.bf16.mxu0 %v3848_v33 }
 0x539   :  { %3519 = vmatpush3.bf16.msra.mxu0 %v3730_v25 }
 0x53a   :  { %3535 = vmatprep.subr.mxu0 %v3848_v33 }
 0x53c   :  { %3485 = vmatmul.mubr.msk.bf16.gmra.mxu0 %vm95_vm0, %v3719_v17  ;;  %v1373_v17 = vrot.slane %v1367_v16, %v3955_v24 }
 0x53d   :  { %3520 = vmatprep.mubr.msk.bf16.mxu0 %vm3849_vm2, %v3848_v33 }
 0x5ec   :  { %v952_v26 = vpop.f32.mrf.mxu0 }
 0x5ee   :  { %v3478_v28 = vpop.f32.mrf.mxu0 }
 0x5ef   :  { %v1385_v28 = vld [vmem:[#allocation2 + $0xc8] sm:$0xff] }
 0x5f0   :  { %v955_v29 = vpop.f32.mrf.mxu0 }
 0x5f1   :  { %v975_v46 = vpack.c.bf16 %v955_v29, %v952_v26  ;;  %v1386_v29 = vld [vmem:[#allocation2 + $0xd0] sm:$0xff] }
 0x5f2   :  { %v3479_v30 = vpop.f32.mrf.mxu0 }
 0x5f3   :  { %v1387_v30 = vld [vmem:[#allocation2 + $0xd8] sm:$0xff] }
 0x5f4   :  { %v960_v31 = vpop.f32.mrf.mxu0 }
 0x5f6   :  { %v3482_v32 = vpop.f32.mrf.mxu0 }
 0x5f8   :  { %v963_v34 = vpop.f32.mrf.mxu0 }
 0x5f9   :  { %v984_v36 = vpack.c.bf16 %v963_v34, %v960_v31  ;;  %v1492_v31 = vld [vmem:[#allocation2 + $0x100] sm:$0xf] }
 0x5fa   :  { %v3483_v37 = vpop.f32.mrf.mxu0 }
 0x5fb   :  { %3497 = vmatmul.mubr.msk.bf16.vlgmr.msra.gmra.mxu1 %vm408_vm3, %v984_v36  ;;  %v3732_v37 = vld [vmem:[#allocation5 + $0xc0] sm:$0xff]  }
 0x5fc   :  { %3501 = vmatpush3.bf16.msra.mxu1 %v3725_v35  ;;  %v968_v38 = vpop.f32.mrf.mxu0  ;;  %3508 = vmatprep.mubr.msk.bf16.mxu1 %vm3849_vm2, %v3848_v33 }
 0x5fd   :  { %3502 = vmatprep.subr.bf16.mxu1 %v3848_v33 }
 0x5fe   :  { %v3486_v40 = vpop.f32.mrf.mxu0 }
 0x600   :  { %3503 = vmatpush3.bf16.msra.mxu1 %v3727_v39  ;;  %v971_v41 = vpop.f32.mrf.mxu0 }
 0x601   :  { %3504 = vmatprep.subr.bf16.mxu1 %v3848_v33  ;;  %v1129_v43 = vpack.c.bf16 %v971_v41, %v968_v38 }
 0x602   :  { %v3487_v44 = vpop.f32.mrf.mxu0 }
 0x603   :  { %3521 = vmatmul.mubr.msk.bf16.vlgmr.msra.gmra.mxu0 %vm408_vm3, %v1129_v43 }
 0x604   :  { %3505 = vmatpush3.bf16.msra.mxu1 %v3729_v42  ;;  %3543 = vmatprep.mubr.msk.f32.mxu0 %vm3849_vm2, %v3848_v33 }
 0x605   :  { %3506 = vmatprep.subr.bf16.mxu1 %v3848_v33  ;;  %3536 = vmatpush3.msra.mxu0 %v1287_v47 }
 0x606   :  { %3537 = vmatprep.subr.mxu0 %v3848_v33 }
 0x607   :  { %3538 = vmatpush3.msra.mxu0 %v1286_v48 }
 0x608   :  { %3507 = vmatpush3.bf16.msra.mxu1 %v3731_v45  ;;  %3539 = vmatprep.subr.mxu0 %v3848_v33 }
 0x609   :  { %3524 = vmatprep.subr.mxu1 %v3848_v33  ;;  %3540 = vmatpush3.msra.mxu0 %v1285_v49 }
 0x60a   :  { %3541 = vmatprep.subr.mxu0 %v3848_v33 }
 0x60b   :  { %3509 = vmatmul.mubr.msk.bf16.vlgmr.msra.gmra.mxu1 %vm408_vm3, %v975_v46  ;;  %3542 = vmatpush3.msra.mxu0 %v1284_v9 }
 0x60c   :  { %3532 = vmatprep.mubr.msk.f32.mxu1 %vm3849_vm2, %v3848_v33  ;;  %3554 = vmatprep.subr.msk.mxu0 %vm624_vm6, %v1492_v31 }
 0x6bb   :  { %v1054_v50 = vpop.f32.mrf.mxu1 }
 0x6bd   :  { %v3498_v51 = vpop.f32.mrf.mxu1 }
 0x6be   :  { %v3733_v51 = vld [vmem:[#allocation5 + $0xc8] ss:$0 sps:$4 sm:$0xff]  }
 0x6bf   :  { %v1057_v52 = vpop.f32.mrf.mxu1 }
 0x6c1   :  { %v3499_v53 = vpop.f32.mrf.mxu1 }
 0x6c2   :  { %v3735_v53 = vld [vmem:[#allocation5 + $0xe8] sm:$0xff]  }
 0x6c3   :  { %v1199_v54 = vpop.f32.mrf.mxu0 }
 0x6c5   :  { %v3522_v55 = vpop.f32.mrf.mxu0 }
 0x6c6   :  { %v3737_v55 = vld [vmem:[#allocation5 + $0xe0] sm:$0xff]  }
 0x6c7   :  { %v1202_v56 = vpop.f32.mrf.mxu0 }
 0x6c9   :  { %v3523_v57 = vpop.f32.mrf.mxu0 }
 0x6cb   :  { %v1122_v58 = vpop.f32.mrf.mxu1 }
 0x6cc   :  { %v1123_v60 = vadd.f32 %v1122_v58, %v1054_v50 }
 0x6cd   :  { %v3510_v59 = vpop.f32.mrf.mxu1 }
 0x6ce   :  { %v4027_v2 = vadd.f32 %v1199_v54, %v1123_v60  ;;  %v3736_v54 = vld [vmem:[#allocation5 + $0xd0] sm:$0xff]  }
 0x6cf   :  { %v1125_v61 = vpop.f32.mrf.mxu1 }
 0x6d0   :  { %v1126_v63 = vadd.f32 %v1125_v61, %v1057_v52  ;;  %v1208_v7 = vmul.f32 %v4027_v2, %v4027_v2  ;;  %v3734_v52 = vld [vmem:[#allocation5 + $0xd8] sm:$0xff]  }
 0x6d1   :  { %v3511_v1 = vpop.f32.mrf.mxu1  ;;  %v3738_v61 = vld [vmem:[#allocation5 + $0xf8] sm:$0xff]  }
 0x6d2   :  { %v1207_v3 = vadd.f32 %v1202_v56, %v1126_v63  ;;  %v3739_v1 = vld [vmem:[#allocation5 + $0xf0] sm:$0xff]  }
 0x6d4   :  { %v1209_v5 = vmul.f32 %v1207_v3, %v1207_v3 }
 0x6d6   :  { %3525 = vmatpush3.msra.mxu1 %v1209_v5  ;;  %v1927_v5 = vld [vmem:[#allocation2 + $0x138] sm:$0xff] }
 0x6d7   :  { %3526 = vmatprep.subr.mxu1 %v3848_v33 }
 0x6d8   :  { %3527 = vmatpush3.msra.mxu1 %v1208_v7  ;;  %v1926_v7 = vld [vmem:[#allocation2 + $0x130] sm:$0xff] }
 0x6d9   :  { %3528 = vmatprep.subr.mxu1 %v3848_v33 }
 0x6da   :  { %3529 = vmatpush3.msra.mxu1 %v1207_v3 }
 0x6db   :  { %3530 = vmatprep.subr.mxu1 %v3848_v33 }
 0x6dc   :  { %3531 = vmatpush3.msra.mxu1 %v4027_v2 }
 0x6dd   :  { %3533 = vmatmul.mubr.msk.f32.vlgmr.msra.gmra.mxu1 %vm95_vm0, %v1210_v8 }
 0x6de   :  { %3548 = vmatprep.mubr.msk.f32.mxu1 %vm599_vm4, %v1384_v12 }
 0x79d   :  { %v1280_v10 = vpop.f32.mrf.mxu1 }
 0x79e   :  { %3544 = vmatmul.mubr.msk.f32.vlgmr.msra.gmra.mxu0 %vm95_vm0, %v1280_v10 }
 0x79f   :  { %v3534_v11 = vpop.f32.mrf.mxu1  ;;  %3555 = vmatpush3.msk.msra.mxu0 %vm624_vm6, %v1492_v31 }
 0x7a0   :  { %3568 = vmatprep.subr.bf16.mxu0 %v3848_v33 }
 0x85e   :  { %v1357_v6 = vpop.f32.mrf.mxu0 }
 0x85f   :  { %v1361_v13 = vmul.f32 0.015625, %v1357_v6 }
 0x860   :  { %v3545_v0 = vpop.f32.mrf.mxu0 }
 0x861   :  { %v1362_v14 = vmul.f32 %v1361_v13, %v1361_v13 }
 0x863   :  { %v1364_v4 = vrot.slane %v1362_v14, 6 }
 0x865   :  { %v1366_v62 = vsub.f32 %v1361_v13, %v1364_v4 }
 0x867   :  { %v1368_v15 = vadd.f32 1e-05, %v1366_v62 }
 0x869   :  { %3744 = vrsqrt.f32 %v1368_v15 }
 0x876   :  { %v3745_v18 = vpop.eup %3744 }
 0x877   :  { %v1374_v19 = vmul.f32 %v3745_v18, %v1373_v17  ;;  %v1851_v18 = vld [vmem:[#allocation2 + $0x110] sm:$0xf] }
 0x879   :  { %v1376_v20 = vrot.slane %v1374_v19, 2 }
 0x87b   :  { %v1378_v22 = vmul.f32 %v1376_v20, %v1361_v13 }
 0x87d   :  { %v1383_v23 = vsub.f32 %v1382_v21, %v1378_v22 }
 0x87f   :  { %v1389_v25 = vrot.slane %v1383_v23, 6  ;;  %v2025_v23 = vld [vmem:[#allocation2 + $0x118] sm:$0xff] }
 0x881   :  { %v1391_v26 = vsel %vm597_vm5, %v1376_v20, %v1389_v25  ;;  %v1925_v20 = vld [vmem:[#allocation2 + $0x128] sm:$0xff] }
 0x882   :  { %3546 = vmatprep.subr.msk.mxu1 %vm624_vm6, %v1391_v26 }
 0x883   :  { %3547 = vmatpush3.msk.msra.mxu1 %vm624_vm6, %v1391_v26 }
 0x884   :  { %3549 = vmatmul.mubr.msk.f32.vlgmr.msra.gmra.mxu1 %vm599_vm4, %v1385_v28 }
 0x885   :  { %3551 = vmatprep.mubr.msk.f32.mxu1 %vm599_vm4, %v1386_v29 }
 0x888   :  { %3552 = vmatmul.mubr.msk.f32.gmra.mxu1 %vm599_vm4, %v1387_v30 }
 0x889   :  { %3564 = vmatprep.mubr.msk.bf16.mxu1 %vm209_vm1, %v3732_v37 }
 0x944   :  { %v3550_v32 = vpop.f32.mrf.mxu1 }
 0x946   :  { %v1473_v34 = vpop.f32.mrf.mxu1 }
 0x947   :  { %3556 = vmatprep.mubr.msk.f32.mxu0 %vm599_vm4, %v1473_v34  ;;  %v2008_v34 = vld [vmem:[#allocation2 + $0x150] sm:$0x3] }
 0x948   :  { %v3553_v35 = vpop.f32.mrf.mxu1  ;;  %3557 = vmatmul.mubr.msk.f32.vlgmr.msra.gmra.mxu0 %vm599_vm4, %v3550_v32 }
 0x949   :  { %3569 = vmatpush3.bf16.msra.mxu0 %v3735_v53 }
 0x94a   :  { %v1483_v36 = vpop.f32.mrf.mxu1  ;;  %3570 = vmatprep.subr.bf16.mxu0 %v3848_v33 }
 0x94b   :  { %3559 = vmatprep.mubr.msk.f32.mxu0 %vm599_vm4, %v1483_v36 }
 0x94c   :  { %3560 = vmatmul.mubr.msk.f32.gmra.mxu0 %vm599_vm4, %v3553_v35  ;;  %v2014_v35 = vrot.slane %v2008_v34, %v3955_v24  ;;  %v2115_v24 = vld [vmem:[#allocation2 + $0x148] sm:$0xff] }
 0x94d   :  { %3572 = vmatprep.mubr.msk.bf16.mxu0 %vm3849_vm2, %v3848_v33  ;;  %3571 = vmatpush3.bf16.msra.mxu0 %v3737_v55 }
 0x94e   :  { %3584 = vmatprep.subr.bf16.mxu0 %v3848_v33 }
 0xa08   :  { %v3558_v38 = vpop.f32.mrf.mxu0 }
 0xa09   :  { %v1594_v40 = vmul.f32 %v3558_v38, %v1207_v3  ;;  %v1928_v3 = vld [vmem:[#allocation2 + $0x140] sm:$0xff] }
 0xa0a   :  { %v1574_v39 = vpop.f32.mrf.mxu0 }
 0xa0b   :  { %v1593_v42 = vmul.f32 %v1574_v39, %v4027_v2  ;;  %v2023_v39 = vrot.slane %v2008_v34, %v3958_v27 }
 0xa0c   :  { %v3561_v41 = vpop.f32.mrf.mxu0 }
 0xa0d   :  { %v1596_v43 = vadd.f32 %v3561_v41, %v1594_v40 }
 0xa0e   :  { %v1584_v44 = vpop.f32.mrf.mxu0 }
 0xa0f   :  { %v1600_v45 = vmul.f32 0.3, %v1596_v43  ;;  %v1595_v46 = vadd.f32 %v1593_v42, %v1584_v44  ;;  %vm1598_vm11 = vcmp.ge.f32.partialorder %v1596_v43, 0.0  ;;  %v2026_v44 = vld [vmem:[#allocation2 + $0x120] sm:$0xff] }
 0xa11   :  { %vm1597_vm12 = vcmp.ge.f32.partialorder %v1595_v46, 0.0  ;;  %v1599_v47 = vmul.f32 0.3, %v1595_v46  ;;  %v1602_v49 = vsel %vm1598_vm11, %v1596_v43, %v1600_v45 }
 0xa13   :  { %v1601_v48 = vsel %vm1597_vm12, %v1595_v46, %v1599_v47  ;;  %v4098_v46 = vld [vmem:[#allocation2 + $0x160] sm:$0xff]  ;;  %v4102_v47 = vld [vmem:[#allocation2 + $0x158] sm:$0xff] }
 0xa14   :  { %v1606_v50 = vpack.c.bf16 %v1602_v49, %v1601_v48  ;;  %v3740_v48 = vld [vmem:[#allocation5 + $0x108] sm:$0xff]   ;;  %v3741_v49 = vld [vmem:[#allocation5 + $0x100] sm:$0xff]  }
 0xa16   :  { %3562 = vmatprep.subr.bf16.mxu1 %v1606_v50 }
 0xa17   :  { %3563 = vmatpush3.bf16.msra.mxu1 %v1606_v50 }
 0xa18   :  { %3576 = vmatprep.subr.bf16.mxu1 %v3848_v33 }
 0xa1a   :  { %3565 = vmatmul.mubr.msk.bf16.vlgmr.msra.gmra.mxu1 %vm209_vm1, %v3733_v51 }
 0xa1b   :  { %3577 = vmatpush3.bf16.msra.mxu1 %v3734_v52  ;;  %3580 = vmatprep.mubr.msk.bf16.mxu1 %vm3849_vm2, %v3848_v33  ;;  %v4119_v52 = vld [vmem:[#allocation2 + $0x170] ss:$0 sm:$0xff] }
 0xa1c   :  { %3578 = vmatprep.subr.bf16.mxu1 %v3848_v33 }
 0xa1f   :  { %3579 = vmatpush3.bf16.msra.mxu1 %v3736_v54 }
 0xa20   :  { %3592 = vmatprep.subr.mxu1 %v3848_v33 }
 0xada   :  { %v3566_v56 = vpop.f32.mrf.mxu1 }
 0xadb   :  { %v1789_v2 = vpack.c.bf16 %v3566_v56, %v3566_v56 }
 0xadc   :  { %v1655_v57 = vpop.f32.mrf.mxu1 }
 0xadd   :  { %v1669_v58 = vpack.c.bf16 %v1655_v57, %v1655_v57 }
 0xade   :  { %v3567_v59 = vpop.f32.mrf.mxu1 }
 0xadf   :  { %3581 = vmatmul.mubr.msk.bf16.vlgmr.msra.gmra.mxu1 %vm95_vm0, %v1669_v58 }
 0xae0   :  { %v1658_v60 = vpop.f32.mrf.mxu1  ;;  %3596 = vmatprep.mubr.msk.f32.mxu1 %vm3849_vm2, %v3848_v33 }
 0xae1   :  { %v1674_v63 = vpack.c.bf16 %v1658_v60, %v1658_v60 }
 0xae3   :  { %3573 = vmatmul.mubr.msk.bf16.vlgmr.msra.gmra.mxu0 %vm95_vm0, %v1674_v63 }
 0xae4   :  { %3585 = vmatpush3.bf16.msra.mxu0 %v3738_v61  ;;  %3588 = vmatprep.mubr.msk.bf16.mxu0 %vm3849_vm2, %v3848_v33  ;;  %v3205_v61 = vld [vmem:[#allocation2 + $0x168] ss:$0 sm:$0xff] }
 0xae5   :  { %3586 = vmatprep.subr.bf16.mxu0 %v3848_v33 }
 0xae8   :  { %3587 = vmatpush3.bf16.msra.mxu0 %v3739_v1 }
 0xae9   :  { %3599 = vmatprep.subr.mxu0 %v3848_v33 }
 0xaeb   :  { %3589 = vmatmul.mubr.msk.bf16.vlgmr.msra.gmra.mxu0 %vm95_vm0, %v1789_v2 }
 0xaec   :  { %3607 = vmatprep.mubr.msk.f32.mxu0 %vm3849_vm2, %v3848_v33  ;;  %3600 = vmatpush3.msra.mxu0 %v1928_v3 }
 0xaed   :  { %3601 = vmatprep.subr.mxu0 %v3848_v33 }
 0xaee   :  { %3602 = vmatpush3.msra.mxu0 %v1927_v5 }
 0xaef   :  { %3603 = vmatprep.subr.mxu0 %v3848_v33 }
 0xaf0   :  { %3604 = vmatpush3.msra.mxu0 %v1926_v7 }
 0xaf1   :  { %3605 = vmatprep.subr.mxu0 %v3848_v33 }
 0xaf2   :  { %3606 = vmatpush3.msra.mxu0 %v1925_v20 }
 0xaf3   :  { %3615 = vmatprep.subr.mxu0 %v2115_v24 }
 0xb9f   :  { %v1783_v8 = vpop.f32.mrf.mxu1 }
 0xba1   :  { %v3582_v9 = vpop.f32.mrf.mxu1 }
 0xba3   :  { %v1728_v10 = vpop.f32.mrf.mxu0  ;;  %v1786_v11 = vpop.f32.mrf.mxu1 }
 0xba4   :  { %v1784_v14 = vadd.f32 %v1783_v8, %v1728_v10  ;;  %v3851_v11 = vmov 0  }
 0xba5   :  { %v3574_v12 = vpop.f32.mrf.mxu0  ;;  %v3583_v6 = vpop.f32.mrf.mxu1  ;;  %3706 = vset.pattern.permute.xlu1 %v3851_v11  ;;  %3707 = vset.pattern.permute.xlu0 %v3851_v11  ;;  %v2623_v11 = vld [vmem:[%s4208_s1 + $0x4] sm:$0x3] }
 0xba6   :  { %v2374_v12 = vld [vmem:[%s4208_s1] sm:$0x3] }
 0xba7   :  { %v1731_v13 = vpop.f32.mrf.mxu0  ;;  %2377 = vperm.xlu1 %3706, %v2374_v12   ;;  %v2381_v6 = vsub.f32 1.0, %v2374_v12 }
 0xba9   :  { %v3575_v0 = vpop.f32.mrf.mxu0 }
 0xbab   :  { %v1843_v4 = vpop.f32.mrf.mxu0  ;;  %2384 = vperm.xlu1 %3706, %v2381_v6   ;;  %v2635_v6 = vsub.f32 1.0, %v2623_v11 }
 0xbac   :  { %v4079_v62 = vadd.f32 %v1843_v4, %v1784_v14 }
 0xbad   :  { %v3590_v15 = vpop.f32.mrf.mxu0 }
 0xbae   :  { %v1850_v16 = vmul.f32 %v4079_v62, %v4079_v62 }
 0xbaf   :  { %v1846_v17 = vpop.f32.mrf.mxu0 }
 0xbb0   :  { %3593 = vmatpush3.msra.mxu1 %v1850_v16 }
 0xbb1   :  { %v3591_v19 = vpop.f32.mrf.mxu0  ;;  %3594 = vmatprep.subr.mxu1 %v3848_v33 }
 0xbb2   :  { %3595 = vmatpush3.msra.mxu1 %v4079_v62 }
 0xbb3   :  { %3597 = vmatmul.mubr.msk.f32.vlgmr.msra.gmra.mxu1 %vm209_vm1, %v1851_v18 }
 0xbb4   :  { %3612 = vmatprep.mubr.msk.f32.mxu1 %vm599_vm4, %v2025_v23 }
 0xc22   :  { %v2378_v16 = vpop.permute.xlu1 %2377 }
 0xc73   :  { %v1921_v21 = vpop.f32.mrf.mxu1 }
 0xc74   :  { %3608 = vmatmul.mubr.msk.f32.vlgmr.msra.gmra.mxu0 %vm95_vm0, %v1921_v21  ;;  %v2385_v21 = vpop.permute.xlu1 %2384 }
 0xc75   :  { %v3598_v22 = vpop.f32.mrf.mxu1  ;;  %3616 = vmatpush3.msra.mxu0 %v2115_v24 }
 0xc76   :  { %3628 = vmatprep.subr.mxu0 %v3848_v33 }
 0xd34   :  { %v1998_v25 = vpop.f32.mrf.mxu0 }
 0xd35   :  { %v2002_v26 = vmul.f32 0.0625, %v1998_v25  ;;  %v2387_v25 = vmul.f32 0.0, %v2385_v21 }
 0xd36   :  { %v3609_v28 = vpop.f32.mrf.mxu0 }
 0xd37   :  { %v2003_v29 = vmul.f32 %v2002_v26, %v2002_v26 }
 0xd39   :  { %v2005_v30 = vrot.slane %v2003_v29, 6 }
 0xd3b   :  { %v2007_v31 = vsub.f32 %v2002_v26, %v2005_v30 }
 0xd3d   :  { %v2009_v32 = vadd.f32 1e-05, %v2007_v31 }
 0xd3f   :  { %3746 = vrsqrt.f32 %v2009_v32 }
 0xd4c   :  { %v3747_v36 = vpop.eup %3746 }
 0xd4d   :  { %v2015_v37 = vmul.f32 %v3747_v36, %v2014_v35 }
 0xd4f   :  { %v2017_v38 = vrot.slane %v2015_v37, 2 }
 0xd51   :  { %v2019_v40 = vmul.f32 %v2017_v38, %v2002_v26 }
 0xd53   :  { %v2024_v41 = vsub.f32 %v2023_v39, %v2019_v40  ;;  %v2494_v40 = vld [vmem:[%s4208_s1 + $0x2] sm:$0x3] }
 0xd55   :  { %v2028_v42 = vrot.slane %v2024_v41, 6 }
 0xd57   :  { %v2030_v43 = vsel %vm597_vm5, %v2017_v38, %v2028_v42  ;;  %v2506_v42 = vsub.f32 1.0, %v2494_v40 }
 0xd58   :  { %3610 = vmatprep.subr.msk.mxu1 %vm624_vm6, %v2030_v43 }
 0xd59   :  { %3611 = vmatpush3.msk.msra.mxu1 %vm624_vm6, %v2030_v43 }
 0xd5a   :  { %3613 = vmatmul.mubr.msk.f32.vlgmr.msra.gmra.mxu1 %vm599_vm4, %v2026_v44  ;;  %3620 = vmatprep.subr.bf16.mxu1 %v3848_v33 }
 0xd5b   :  { %3624 = vmatprep.mubr.msk.bf16.mxu1 %vm3849_vm2, %v3848_v33  ;;  %3621 = vmatpush3.bf16.msra.mxu1 %v3740_v48 }
 0xd5c   :  { %3622 = vmatprep.subr.bf16.mxu1 %v3848_v33 }
 0xd5f   :  { %3623 = vmatpush3.bf16.msra.mxu1 %v3741_v49 }
 0xd60   :  { %3649 = vmatprep.subr.mxu1 %v3848_v33 }
 0xe1a   :  { %v3614_v27 = vpop.f32.mrf.mxu1 }
 0xe1c   :  { %v2106_v45 = vpop.f32.mrf.mxu1 }
 0xe1d   :  { %3617 = vmatprep.mubr.msk.f32.mxu0 %vm2116_vm13, %v2106_v45 }
 0xe1e   :  { %3618 = vmatmul.mubr.msk.f32.vlgmr.msra.gmra.mxu0 %vm2116_vm13, %v3614_v27 }
 0xe1f   :  { %3629 = vmatpush3.msra.mxu0 %v4098_v46  ;;  %3632 = vmatprep.mubr.msk.f32.mxu0 %vm3849_vm2, %v3848_v33 }
 0xe20   :  { %3630 = vmatprep.subr.mxu0 %v3848_v33 }
 0xe21   :  { %3631 = vmatpush3.msra.mxu0 %v4102_v47 }
 0xe22   :  { %3633 = vmatmul.mubr.f32.vlgmr.msra.gmra.mxu0 %v3848_v33  ;;  %3635 = vmatprep.subr.mxu0 %v3848_v33 }
 0xe23   :  { %3636 = vmatpush3.msra.mxu0 %v4098_v46  ;;  %3639 = vmatprep.mubr.msk.f32.mxu0 %vm3849_vm2, %v3848_v33 }
 0xe24   :  { %3637 = vmatprep.subr.mxu0 %v3848_v33 }
 0xe25   :  { %3638 = vmatpush3.msra.mxu0 %v4102_v47 }
 0xe26   :  { %3642 = vmatprep.subr.mxu0 %v3848_v33 }
 0xede   :  { %v3619_v50 = vpop.f32.mrf.mxu0 }
 0xee0   :  { %v2189_v51 = vpop.f32.mrf.mxu0 }
 0xee1   :  { %v2198_v53 = vmul.f32 %v2189_v51, %v4079_v62 }
 0xee2   :  { %v2344_v54 = vpop.f32.mrf.mxu0 }
 0xee3   :  { %v2199_v55 = vadd.f32 %v3619_v50, %v2198_v53  ;;  %v2345_v56 = vadd.f32 %v4119_v52, %v2344_v54 }
 0xee4   :  { %v3634_v57 = vpop.f32.mrf.mxu0 }
 0xee5   :  { %vm2200_vm14 = vcmp.ge.f32.partialorder %v2199_v55, 0.0  ;;  %v2201_v58 = vmul.f32 0.3, %v2199_v55  ;;  %2356 = vrot.lane.b32.xlu0 %v2345_v56, %s3850_s0 }
 0xee7   :  { %v2202_v59 = vsel %vm2200_vm14, %v2199_v55, %v2201_v58 }
 0xee8   :  { %v2203_v60 = vpack.c.bf16 %v2202_v59, %v2202_v59 }
 0xeea   :  { %3625 = vmatmul.mubr.msk.bf16.vlgmr.msra.gmra.mxu1 %vm95_vm0, %v2203_v60 }
 0xeeb   :  { %3650 = vmatpush3.msra.mxu1 %v4098_v46  ;;  %3653 = vmatprep.mubr.msk.f32.mxu1 %vm3849_vm2, %v3848_v33 }
 0xeec   :  { %3651 = vmatprep.subr.mxu1 %v3848_v33 }
 0xeed   :  { %3652 = vmatpush3.msra.mxu1 %v4102_v47 }
 0xeee   :  { %3663 = vmatprep.subr.mxu1 %v3848_v33 }
 0xf57   :  { %v2357_v13 = vpop.permute.xlu0 %2356 }
 0xfaa   :  { %v2262_v63 = vpop.f32.mrf.mxu1 }
 0xfab   :  { %v4131_v1 = vadd.f32 %v3205_v61, %v2262_v63 }
 0xfac   :  { %v3626_v2 = vpop.f32.mrf.mxu1 }
 0xfad   :  { %v2348_v3 = vadd.f32 %v2345_v56, %v4131_v1 }
 0xfae   :  { %v2265_v5 = vpop.f32.mrf.mxu1 }
 0xfaf   :  { %v3210_v7 = vmul.f32 -1.442695, %v2348_v3 }
 0xfb0   :  { %v3627_v8 = vpop.f32.mrf.mxu1 }
 0xfb1   :  { %3748 = vpow2.f32 %v3210_v7 }
 0xfbe   :  { %v3749_v9 = vpop.eup %3748 }
 0xfbf   :  { %v2352_v10 = vadd.f32 1.0, %v3749_v9 }
 0xfc1   :  { %3750 = vrcp.f32 %v2352_v10 }
 0xfce   :  { %v3751_v0 = vpop.eup %3750 }
 0xfcf   :  { %v2359_v14 = vmul.f32 %v3751_v0, %v2357_v13  ;;  %v2366_v17 = vsub.f32 1.0, %v3751_v0  ;;  %v2372_v19 = vmul.f32 0.0, %v3751_v0 }
 0xfd1   :  { %2361 = vrot.lane.b32.xlu0 %v2359_v14, %s3852_s11 }
0x1043   :  { %v2362_v4 = vpop.permute.xlu0 %2361 }
0x1044   :  { %v2364_v62 = vadd.f32 %v2362_v4, %v4131_v1 }
0x1046   :  { %3752 = vtanh.f32 %v2364_v62 }
0x1053   :  { %v3753_v15 = vpop.eup %3752 }
0x1054   :  { %2368 = vrot.lane.b32.xlu0 %v3753_v15, %s3853_s12 }
0x10c6   :  { %v2369_v18 = vpop.permute.xlu0 %2368 }
0x10c7   :  { %v2371_v20 = vmul.f32 %v2369_v18, %v2366_v17 }
0x10c9   :  { %v2373_v22 = vadd.f32 %v2372_v19, %v2371_v20 }
0x10cb   :  { %v2380_v23 = vmul.f32 %v2378_v16, %v2373_v22 }
0x10cd   :  { %v2388_v26 = vadd.f32 %v2387_v25, %v2380_v23 }
0x10cf   :  { %2390 = vrot.lane.b32.xlu1 %v2388_v26, %s3853_s12  ;;  %v2490_v45 = vrot.slane %v2388_v26, 6 }
0x1141   :  { %v2391_v28 = vpop.permute.xlu1 %2390 }
0x1142   :  { %3640 = vmatmul.mubr.msk.f32.vlgmr.msra.gmra.mxu0 %vm209_vm1, %v2391_v28 }
0x1143   :  { %3643 = vmatpush3.msra.mxu0 %v4098_v46  ;;  %3646 = vmatprep.mubr.msk.f32.mxu0 %vm3849_vm2, %v3848_v33 }
0x1144   :  { %3644 = vmatprep.subr.mxu0 %v3848_v33 }
0x1145   :  { %3645 = vmatpush3.msra.mxu0 %v4102_v47 }
0x1146   :  { %3656 = vmatprep.subr.mxu0 %v3848_v33 }
0x1202   :  { %v2460_v29 = vpop.f32.mrf.mxu0 }
0x1203   :  { %v2461_v30 = vadd.f32 %v4119_v52, %v2460_v29 }
0x1204   :  { %v3641_v31 = vpop.f32.mrf.mxu0 }
0x1205   :  { %v2465_v32 = vrot.slane %v2461_v30, 6 }
0x1207   :  { %2474 = vrot.lane.b32.xlu0 %v2465_v32, %s3850_s0  ;;  %v2467_v34 = vadd.f32 %v2465_v32, %v4131_v1 }
0x1209   :  { %v3212_v35 = vmul.f32 -1.442695, %v2467_v34 }
0x120b   :  { %3754 = vpow2.f32 %v3212_v35 }
0x1218   :  { %v3755_v36 = vpop.eup %3754 }
0x1219   :  { %v2471_v37 = vadd.f32 1.0, %v3755_v36 }
0x121b   :  { %3756 = vrcp.f32 %v2471_v37 }
0x1228   :  { %v3757_v38 = vpop.eup %3756 }
0x1229   :  { %v2484_v27 = vsub.f32 1.0, %v3757_v38  ;;  %v2492_v48 = vmul.f32 %v3757_v38, %v2490_v45 }
0x1279   :  { %v2475_v39 = vpop.permute.xlu0 %2474 }
0x127a   :  { %v2477_v41 = vmul.f32 %v3757_v38, %v2475_v39 }
0x127c   :  { %2479 = vrot.lane.b32.xlu1 %v2477_v41, %s3852_s11 }
0x1280   :  { %2509 = vperm.xlu1 %3706, %v2506_v42  }
0x12ee   :  { %v2480_v43 = vpop.permute.xlu1 %2479 }
0x12ef   :  { %v2482_v44 = vadd.f32 %v2480_v43, %v4131_v1 }
0x12f1   :  { %3758 = vtanh.f32 %v2482_v44 }
0x12fb   :  { %v2510_v51 = vpop.permute.xlu1 %2509 }
0x12fc   :  { %v2512_v53 = vmul.f32 %v2510_v51, %v2388_v26 }
0x12fe   :  { %v3759_v24 = vpop.eup %3758 }
0x12ff   :  { %2486 = vrot.lane.b32.xlu0 %v3759_v24, %s3853_s12  ;;  %v2769_v24 = vld [vmem:[#allocation2 + $0x180] sm:$0xff] }
0x1303   :  { %2497 = vperm.xlu0 %3707, %v2494_v40  }
0x1371   :  { %v2487_v46 = vpop.permute.xlu0 %2486 }
0x1372   :  { %v2489_v47 = vmul.f32 %v2487_v46, %v2484_v27  ;;  %v2768_v27 = vld [vmem:[#allocation2 + $0x178] sm:$0xff]  ;;  %v2851_v46 = vld [vmem:[#allocation2 + $0x1a8] sm:$0xff] }
0x1374   :  { %v2493_v49 = vadd.f32 %v2492_v48, %v2489_v47  ;;  %v2850_v47 = vld [vmem:[#allocation2 + $0x1a0] sm:$0xff] }
0x1376   :  { %v2501_v50 = vrot.slane %v2493_v49, 2 }
0x1378   :  { %2502 = vrot.lane.b32.xlu1 %v2501_v50, %s3853_s12 }
0x137c   :  { %2514 = vrot.lane.b32.xlu1 %v2512_v53, %s3853_s12 }
0x137e   :  { %v2498_v54 = vpop.permute.xlu0 %2497 }
0x13ea   :  { %v2503_v55 = vpop.permute.xlu1 %2502 }
0x13eb   :  { %v2505_v56 = vmul.f32 %v2503_v55, %v2498_v54 }
0x13ee   :  { %v2515_v57 = vpop.permute.xlu1 %2514 }
0x13ef   :  { %v2517_v58 = vadd.f32 %v2515_v57, %v2505_v56 }
0x13f1   :  { %3647 = vmatmul.mubr.msk.f32.vlgmr.msra.gmra.mxu0 %vm209_vm1, %v2517_v58  ;;  %v2617_v12 = vrot.slane %v2517_v58, 4 }
0x13f2   :  { %3660 = vmatprep.mubr.msk.f32.mxu0 %vm3849_vm2, %v3848_v33  ;;  %3657 = vmatpush3.msra.mxu0 %v2769_v24 }
0x13f3   :  { %3658 = vmatprep.subr.mxu0 %v3848_v33 }
0x13f4   :  { %3659 = vmatpush3.msra.mxu0 %v2768_v27 }
0x13f5   :  { %3674 = vmatprep.subr.mxu0 %v3848_v33 }
0x14b1   :  { %v2587_v59 = vpop.f32.mrf.mxu0 }
0x14b2   :  { %v2588_v60 = vadd.f32 %v4119_v52, %v2587_v59 }
0x14b3   :  { %v3648_v61 = vpop.f32.mrf.mxu0 }
0x14b4   :  { %v2592_v63 = vrot.slane %v2588_v60, 4  ;;  %v2849_v60 = vld [vmem:[#allocation2 + $0x198] sm:$0xff]  ;;  %v2848_v61 = vld [vmem:[#allocation2 + $0x190] sm:$0xff] }
0x14b6   :  { %2601 = vrot.lane.b32.xlu0 %v2592_v63, %s3850_s0  ;;  %v2594_v2 = vadd.f32 %v2592_v63, %v4131_v1  ;;  %v3217_v63 = vld [vmem:[#allocation2 + $0x188] ss:$0 sm:$0xff] }
0x14b8   :  { %v3214_v3 = vmul.f32 -1.442695, %v2594_v2 }
0x14ba   :  { %3760 = vpow2.f32 %v3214_v3 }
0x14c7   :  { %v3761_v5 = vpop.eup %3760 }
0x14c8   :  { %v2598_v7 = vadd.f32 1.0, %v3761_v5 }
0x14ca   :  { %3762 = vrcp.f32 %v2598_v7 }
0x14d7   :  { %v3763_v8 = vpop.eup %3762 }
0x14d8   :  { %v2611_v62 = vsub.f32 1.0, %v3763_v8 }
0x1528   :  { %v2602_v9 = vpop.permute.xlu0 %2601 }
0x1529   :  { %v2604_v10 = vmul.f32 %v3763_v8, %v2602_v9 }
0x152b   :  { %2606 = vrot.lane.b32.xlu1 %v2604_v10, %s3852_s11 }
0x152f   :  { %2618 = vrot.lane.b32.xlu1 %v2617_v12, %s3854_s17 }
0x1533   :  { %2638 = vperm.xlu1 %3706, %v2635_v6  }
0x159d   :  { %v2607_v13 = vpop.permute.xlu1 %2606 }
0x159e   :  { %v2609_v0 = vadd.f32 %v2607_v13, %v4131_v1 }
0x15a0   :  { %3764 = vtanh.f32 %v2609_v0  ;;  %v2937_v0 = vld [vmem:[#allocation2 + $0x1b0] sm:$0xff] }
0x15a1   :  { %v2619_v4 = vpop.permute.xlu1 %2618 }
0x15a2   :  { %v2621_v16 = vmul.f32 %v3763_v8, %v2619_v4 }
0x15ad   :  { %v3765_v14 = vpop.eup %3764 }
0x15ae   :  { %2613 = vrot.lane.b32.xlu0 %v3765_v14, %s3853_s12  ;;  %v2639_v21 = vpop.permute.xlu1 %2638 }
0x15af   :  { %v2641_v23 = vmul.f32 %v2639_v21, %v2517_v58  ;;  %v3221_v21 = vld [vmem:[#allocation2 + $0x1d8] ss:$0 sm:$0xff] }
0x15b2   :  { %2626 = vperm.xlu0 %3707, %v2623_v11  }
0x1620   :  { %v2614_v15 = vpop.permute.xlu0 %2613 }
0x1621   :  { %v2616_v17 = vmul.f32 %v2614_v15, %v2611_v62  ;;  %v3014_v15 = vld [vmem:[#allocation2 + $0x1d0] sm:$0xff] }
0x1623   :  { %v2622_v18 = vadd.f32 %v2621_v16, %v2616_v17  ;;  %v3013_v16 = vld [vmem:[#allocation2 + $0x1c8] sm:$0xff]  ;;  %v3012_v17 = vld [vmem:[#allocation2 + $0x1c0] sm:$0xff] }
0x1625   :  { %v2630_v19 = vrot.slane %v2622_v18, 4  ;;  %v3011_v18 = vld [vmem:[#allocation2 + $0x1b8] sm:$0xff] }
0x1627   :  { %2631 = vrot.lane.b32.xlu0 %v2630_v19, %s3853_s12 }
0x162d   :  { %v2627_v20 = vpop.permute.xlu0 %2626 }
0x1699   :  { %v2632_v22 = vpop.permute.xlu0 %2631 }
0x169a   :  { %v2634_v25 = vmul.f32 %v2632_v22, %v2627_v20 }
0x169c   :  { %v2642_v26 = vadd.f32 %v2641_v23, %v2634_v25 }
0x169e   :  { %3654 = vmatmul.mubr.msk.f32.vlgmr.msra.gmra.mxu1 %vm209_vm1, %v2642_v26  ;;  %v2742_v40 = vrot.slane %v2642_v26, 2 }
0x169f   :  { %3671 = vmatprep.mubr.msk.f32.mxu1 %vm3849_vm2, %v3848_v33  ;;  %3664 = vmatpush3.msra.mxu1 %v2851_v46 }
0x16a0   :  { %3665 = vmatprep.subr.mxu1 %v3848_v33 }
0x16a1   :  { %3666 = vmatpush3.msra.mxu1 %v2850_v47 }
0x16a2   :  { %3667 = vmatprep.subr.mxu1 %v3848_v33 }
0x16a3   :  { %3668 = vmatpush3.msra.mxu1 %v2849_v60 }
0x16a4   :  { %3669 = vmatprep.subr.mxu1 %v3848_v33 }
0x16a5   :  { %3670 = vmatpush3.msra.mxu1 %v2848_v61 }
0x175e   :  { %v2712_v28 = vpop.f32.mrf.mxu1 }
0x175f   :  { %v2713_v29 = vadd.f32 %v4119_v52, %v2712_v28  ;;  %v2748_v52 = vld [vmem:[%s4208_s1 + $0x6] sm:$0x3]  ;;  %s3855_s1 = smov [#allocation7]  }
0x1760   :  { %v3655_v30 = vpop.f32.mrf.mxu1  ;;  %v2760_v41 = vsub.f32 1.0, %v2748_v52  ;;  %s3101_s20 = sshll.u32 %s3855_s1, 4  ;;  %s3102_s20 = int_to_ptr.vmem [resolvable:$true] %s3101_s20 }
0x1761   :  { %v2717_v31 = vrot.slane %v2713_v29, 2  ;;  %s3816_s21 = scalar_lea.vmem %s3102_s20, 32  ;;  %p3821_p11 = scmp.lt.s32.totalorder %s3102_s20, %s3102_s20 }
0x1762   :  { %p3817_p10 = scmp.ne.s32.totalorder %s3102_s20, %s3816_s21  ;;  %p3822_p12 = scmp.lt.s32.totalorder %s3816_s21, %s3816_s21 }
0x1763   :  { %2726 = vrot.lane.b32.xlu1 %v2717_v31, %s3850_s0  ;;  %v2719_v32 = vadd.f32 %v2717_v31, %v4131_v1 }
0x1764   :  { %p3823_p13 = por %p3822_p12, %p3821_p11 }
0x1765   :  { %v3216_v34 = vmul.f32 -1.442695, %v2719_v32 }
0x1766   :  { %p3824_p0 = pnand %p3823_p13, %p3817_p10 }
0x1767   :  { %3766 = vpow2.f32 %v3216_v34 }
0x1774   :  { %v3767_v35 = vpop.eup %3766 }
0x1775   :  { %v2723_v36 = vadd.f32 1.0, %v3767_v35 }
0x1777   :  { %3768 = vrcp.f32 %v2723_v36 }
0x1784   :  { %v3769_v37 = vpop.eup %3768 }
0x1785   :  { %v2736_v48 = vsub.f32 1.0, %v3769_v37 }
0x17d5   :  { %v2727_v38 = vpop.permute.xlu1 %2726 }
0x17d6   :  { %v2729_v39 = vmul.f32 %v3769_v37, %v2727_v38 }
0x17d8   :  { %2731 = vrot.lane.b32.xlu0 %v2729_v39, %s3852_s11 }
0x17dc   :  { %2743 = vrot.lane.b32.xlu0 %v2742_v40, %s3854_s17 }
0x17e0   :  { %2763 = vperm.xlu0 %3707, %v2760_v41  }
0x184a   :  { %v2732_v42 = vpop.permute.xlu0 %2731 }
0x184b   :  { %v2734_v43 = vadd.f32 %v2732_v42, %v4131_v1 }
0x184d   :  { %3770 = vtanh.f32 %v2734_v43 }
0x184e   :  { %v2744_v45 = vpop.permute.xlu0 %2743 }
0x184f   :  { %v2746_v1 = vmul.f32 %v3769_v37, %v2744_v45 }
0x185a   :  { %v3771_v44 = vpop.eup %3770 }
0x185b   :  { %2738 = vrot.lane.b32.xlu1 %v3771_v44, %s3853_s12  ;;  %v2764_v55 = vpop.permute.xlu0 %2763 }
0x185c   :  { %v2766_v57 = vmul.f32 %v2764_v55, %v2642_v26 }
0x185f   :  { %2751 = vperm.xlu1 %3706, %v2748_v52  }
0x18cd   :  { %v2739_v49 = vpop.permute.xlu1 %2738 }
0x18ce   :  { %v2741_v50 = vmul.f32 %v2739_v49, %v2736_v48 }
0x18d0   :  { %v2747_v51 = vadd.f32 %v2746_v1, %v2741_v50 }
0x18d2   :  { %v2755_v53 = vrot.slane %v2747_v51, 6 }
0x18d4   :  { %2756 = vrot.lane.b32.xlu1 %v2755_v53, %s3853_s12 }
0x18da   :  { %v2752_v54 = vpop.permute.xlu1 %2751 }
0x1946   :  { %v2757_v56 = vpop.permute.xlu1 %2756 }
0x1947   :  { %v2759_v58 = vmul.f32 %v2757_v56, %v2752_v54 }
0x1949   :  { %v2767_v59 = vadd.f32 %v2766_v57, %v2759_v58 }
0x194b   :  { %3661 = vmatmul.mubr.msk.f32.vlgmr.msra.gmra.mxu0 %vm209_vm1, %v2767_v59  ;;  %vm3093_vm1 = vcmask 189440  }
0x194c   :  { %3676 = vmatprep.mubr.msk.f32.mxu0 %vm3849_vm2, %v3848_v33  ;;  %3675 = vmatpush3.msra.mxu0 %v2937_v0 }
0x194d   :  { %3679 = vmatprep.subr.mxu0 %v3848_v33 }
0x1a0b   :  { %v2844_v2 = vpop.f32.mrf.mxu0 }
0x1a0c   :  { %v2845_v3 = vadd.f32 %v3217_v63, %v2844_v2 }
0x1a0d   :  { %v3662_v5 = vpop.f32.mrf.mxu0 }
0x1a0e   :  { %3672 = vmatmul.mubr.msk.f32.vlgmr.msra.gmra.mxu1 %vm95_vm0, %v2845_v3 }
0x1ace   :  { %v2921_v7 = vpop.f32.mrf.mxu1 }
0x1acf   :  { %v2926_v8 = vsel %vm2925_vm15, %v2921_v7, -inf }
0x1ad0   :  { %2927 = vmax.xlane.f32.xlu0 %v2926_v8  ;;  %v3673_v9 = vpop.f32.mrf.mxu1 }
0x1b59   :  { %v2928_v10 = vpop.xlane.xlu0 %2927 }
0x1b5a   :  { %v2929_v11 = vsub.f32 %v2921_v7, %v2928_v10 }
0x1b5c   :  { %v2930_v12 = vmul.f32 1.442695, %v2929_v11 }
0x1b5e   :  { %3772 = vpow2.f32 %v2930_v12 }
0x1b6b   :  { %v3773_v6 = vpop.eup %3772 }
0x1b6c   :  { %v2932_v13 = vsel %vm2925_vm15, %v3773_v6, 0.0 }
0x1b6d   :  { %2933 = vadd.xlane.f32.xlu1 %v2932_v13 }
0x1bf6   :  { %v2934_v14 = vpop.xlane.xlu1 %2933 }
0x1bf7   :  { %3774 = vrcp.f32 %v2934_v14 }
0x1c04   :  { %v3775_v4 = vpop.eup %3774 }
0x1c05   :  { %v2936_v62 = vmul.f32 %v3775_v4, %v3773_v6 }
0x1c07   :  { %3677 = vmatmul.mubr.msk.f32.vlgmr.msra.gmra.mxu0 %vm2116_vm13, %v2936_v62 }
0x1c08   :  { %3680 = vmatpush3.msra.mxu0 %v3014_v15  ;;  %3687 = vmatprep.mubr.msk.f32.mxu0 %vm3849_vm2, %v3848_v33 }
0x1c09   :  { %3681 = vmatprep.subr.mxu0 %v3848_v33 }
0x1c0a   :  { %3682 = vmatpush3.msra.mxu0 %v3013_v16 }
0x1c0b   :  { %3683 = vmatprep.subr.mxu0 %v3848_v33 }
0x1c0c   :  { %3684 = vmatpush3.msra.mxu0 %v3012_v17 }
0x1c0d   :  { %3685 = vmatprep.subr.mxu0 %v3848_v33 }
0x1c0e   :  { %3686 = vmatpush3.msra.mxu0 %v3011_v18 }
0x1cc7   :  { %v3007_v19 = vpop.f32.mrf.mxu0 }
0x1cc8   :  { %3688 = vmatmul.mubr.msk.f32.vlgmr.msra.gmra.mxu0 %vm95_vm0, %v3007_v19 }
0x1cc9   :  { %v3678_v20 = vpop.f32.mrf.mxu0 }
0x1d88   :  { %v3089_v22 = vpop.f32.mrf.mxu0 }
0x1d89   :  { %v3090_v23 = vadd.f32 %v3221_v21, %v3089_v22 }
0x1d8a   :  { %v3689_v25 = vpop.f32.mrf.mxu0 }
0x1d8b   :  { %3094 = vst.msk [vmem:[#allocation7] sm:$0x3] %vm3093_vm1, %v3090_v23 }
0x1d8c   :  { %3827 = shalt.err (!%p3824_p0)
}
0x1d8d   :  { %3104 = dma.vmem_to_hbm [thread:$0]  %s3102_s20, 32, %s4211_s4, [#allocation4]  }
0x1d8e   :  { %3840 = dma.done.wait [#allocation4], 32  }
0x1d8f   :  { %3841 = vsyncadd [#allocation4], 4294967264 }
0x1d90   :  { %3108 = vsyncpa [#allocation3], 1 }
0x1d91   :  { %3109 = vsyncpa [#allocation6], 1 }
0x1d92   :  { %3110 = vsyncpa [#allocation4], 1 }

</bundles_post_ra>
